<compile_context>
chip_gen: v6e
topology: v6e:2x2x1
jax: 0.10.0
libtpu: 0.0.40
codegen_flags: <defaults>
</compile_context>

<pallas_src>
import functools

import jax
import jax.numpy as jnp
from jax.experimental import pallas as pl
from jax.experimental.pallas import tpu as pltpu

# ----------------------------- model config ---------------------------------
VOCAB = 100
TYPE_VOCAB = 2
MAX_POS = 16
H = 32          # hidden size
NH = 2          # num attention heads
DH = H // NH    # head dim
FF = 64         # intermediate (FFN) size
LAYERS = 2
LABELS = 2

# ---- misc / embedding slab row offsets (rows of width H, 8-row aligned) ----
_OFF_WORD = 0                       # [VOCAB, H]   word embeddings
_OFF_POS = 104                      # [MAX_POS, H] position embeddings
_OFF_TYPE = _OFF_POS + MAX_POS      # [TYPE_VOCAB, H] token-type embeddings
_OFF_ELNG = 128                     # [1, H] embedding LayerNorm gamma
_OFF_ELNB = 129                     # [1, H] embedding LayerNorm beta
_OFF_WP = 136                       # [H, H] pooler weight
_OFF_BP = _OFF_WP + H               # [1, H] pooler bias
_OFF_WC = 176                       # [H, H] classifier weight (cols >= LABELS are 0)
_OFF_BC = _OFF_WC + H               # [1, H] classifier bias  (lanes >= LABELS are 0)
MSLAB_ROWS = 216

# ---- per-layer bias/LN slab row layout (one (8,128) tile per layer) ---------
_B_QKV, _B_O, _B_1, _B_2, _B_LN1G, _B_LN1B, _B_LN2G, _B_LN2B = range(8)

_VMEM = functools.partial(pl.BlockSpec, memory_space=pltpu.MemorySpace.VMEM)


# ------------------------------ kernel helpers --------------------------------
def _layernorm(x, g, b):
    mu = jnp.mean(x, axis=-1, keepdims=True)
    d = x - mu
    var = jnp.mean(d * d, axis=-1, keepdims=True)
    return d * jax.lax.rsqrt(var + 1e-12) * g + b


def _gelu(x):
    # tanh approximation (HF default 'gelu' is the erf form; difference is tiny)
    c = 0.7978845608028654  # sqrt(2/pi)
    return 0.5 * x * (1.0 + jnp.tanh(c * (x + 0.044715 * x * x * x)))


# ------------------------------ fused kernel ----------------------------------
def _fused_forward_kernel(ids_ref, aux_ref, mslab_ref, wslab_ref, w2_ref,
                          bslab_ref, out_ref, *, B, S):
    # ---------------- embeddings (gather fused into the kernel) ----------------
    ids = ids_ref[...]                                    # [B*S, 2] int32
    word_ids = ids[:, 0:1]                                # [B*S, 1]
    type_ids = ids[:, 1:2]                                # [B*S, 1]

    # Word embedding as one-hot matmul against the VMEM-resident table.
    vocab_iota = jax.lax.broadcasted_iota(jnp.int32, (B * S, VOCAB), 1)
    onehot_w = (vocab_iota == word_ids).astype(jnp.float32)        # [B*S, VOCAB]
    word_tab = mslab_ref[_OFF_WORD:_OFF_WORD + VOCAB, :]           # [VOCAB, H]
    emb = jnp.dot(onehot_w, word_tab, preferred_element_type=jnp.float32)

    # Position embedding: rows 0..S-1 tiled over the batch (static B, S).
    pos_tab = mslab_ref[_OFF_POS:_OFF_POS + S, :]                  # [S, H]
    emb = emb + jnp.concatenate([pos_tab] * B, axis=0)             # [B*S, H]

    # Token-type embedding (2 types): arithmetic select, no gather needed.
    t = type_ids.astype(jnp.float32)                               # [B*S, 1]
    type0 = mslab_ref[_OFF_TYPE:_OFF_TYPE + 1, :]                  # [1, H]
    type1 = mslab_ref[_OFF_TYPE + 1:_OFF_TYPE + 2, :]              # [1, H]
    emb = emb + (1.0 - t) * type0 + t * type1

    h2 = _layernorm(emb,
                    mslab_ref[_OFF_ELNG:_OFF_ELNG + 1, :],
                    mslab_ref[_OFF_ELNB:_OFF_ELNB + 1, :])         # [B*S, H]

    # Additive attention bias, computed ONCE per forward (0 valid, -1e9 pad).
    aux = aux_ref[...]                                             # [B, S+LABELS]
    mask = aux[:, :S]                                              # [B, S]
    bias3 = ((mask - 1.0) * 1e9)[:, None, :]                       # [B, 1, S]

    # ----------------------------- encoder layers ------------------------------
    for l in range(LAYERS):                    # static unroll over layer weights
        w_l = wslab_ref[l]                     # [3, H, 128]
        b_l = bslab_ref[l]                     # [8, 128]
        wqkv = w_l[0, :, :3 * H]               # [H, 3H]  (1/sqrt(DH) folded in Q)
        wo_w = w_l[1, :, :H]                   # [H, H]
        w1_w = w_l[2, :, :FF]                  # [H, FF]
        w2_w = w2_ref[l]                       # [FF, H]

        # Fused QKV projection: one [B*S, H] x [H, 3H] MXU pass.
        qkv = jnp.dot(h2, wqkv, preferred_element_type=jnp.float32)
        qkv = qkv + b_l[_B_QKV:_B_QKV + 1, :3 * H]
        q3 = qkv[:, 0 * H:1 * H].reshape(B, S, H)
        k3 = qkv[:, 1 * H:2 * H].reshape(B, S, H)
        v3 = qkv[:, 2 * H:3 * H].reshape(B, S, H)

        ctx_heads = []
        for hd in range(NH):                   # static per-head slices
            sl = slice(hd * DH, (hd + 1) * DH)
            s = jnp.einsum("bqd,bkd->bqk", q3[:, :, sl], k3[:, :, sl],
                           preferred_element_type=jnp.float32)      # [B, S, S]
            s = s + bias3
            # No max-subtraction: scores are bounded and masked lanes hold
            # -1e9, so exp() underflows to 0 exactly (needs >=1 valid key/row).
            p = jnp.exp(s)
            p = p * pl.reciprocal(jnp.sum(p, axis=-1, keepdims=True), approx=True)
            ctx_heads.append(jnp.einsum("bqk,bkd->bqd", p, v3[:, :, sl],
                                        preferred_element_type=jnp.float32))
        # Heads are lane-contiguous after concat -> a single output-proj dot.
        ctx = jnp.concatenate(ctx_heads, axis=-1).reshape(B * S, H)
        attn = jnp.dot(ctx, wo_w, preferred_element_type=jnp.float32)
        attn = attn + b_l[_B_O:_B_O + 1, :H]
        h2 = _layernorm(h2 + attn,
                        b_l[_B_LN1G:_B_LN1G + 1, :H],
                        b_l[_B_LN1B:_B_LN1B + 1, :H])

        # Feed-forward block.
        ff = jnp.dot(h2, w1_w, preferred_element_type=jnp.float32)
        ff = _gelu(ff + b_l[_B_1:_B_1 + 1, :FF])
        ff = jnp.dot(ff, w2_w, preferred_element_type=jnp.float32)
        ff = ff + b_l[_B_2:_B_2 + 1, :H]
        h2 = _layernorm(h2 + ff,
                        b_l[_B_LN2G:_B_LN2G + 1, :H],
                        b_l[_B_LN2B:_B_LN2B + 1, :H])

    # ---------------- pooler (CLS token) + classifier + loss -------------------
    cls = h2.reshape(B, S, H)[:, 0, :]                              # [B, H]
    wp_w = mslab_ref[_OFF_WP:_OFF_WP + H, :]                        # [H, H]
    bp_w = mslab_ref[_OFF_BP:_OFF_BP + 1, :]                        # [1, H]
    wc_w = mslab_ref[_OFF_WC:_OFF_WC + H, :]                        # [H, H] (cols>=LABELS zero)
    bc_w = mslab_ref[_OFF_BC:_OFF_BC + 1, :]                        # [1, H]

    pooled = jnp.tanh(jnp.dot(cls, wp_w, preferred_element_type=jnp.float32) + bp_w)
    logits_pad = jnp.dot(pooled, wc_w, preferred_element_type=jnp.float32) + bc_w
    logits = logits_pad[:, :LABELS]                                 # [B, LABELS]

    # Mean cross-entropy from one-hot labels (wrapper discards when label=None).
    onehot_lbl = aux[:, S:S + LABELS]                               # [B, LABELS]
    m = jnp.max(logits, axis=-1, keepdims=True)
    lse = m + jnp.log(jnp.sum(jnp.exp(logits - m), axis=-1, keepdims=True))
    nll = -jnp.sum(onehot_lbl * (logits - lse), axis=-1, keepdims=True)   # [B, 1]
    loss11 = jnp.sum(nll, keepdims=True) * (1.0 / B)                      # [1, 1]

    # Single lane-padded output: lanes [0, LABELS) = logits, lane LABELS = loss.
    out = jnp.concatenate(
        [logits,
         jnp.broadcast_to(loss11, (B, 1)),
         jnp.zeros((B, 128 - LABELS - 1), jnp.float32)], axis=-1)         # [B, 128]
    out_ref[...] = out.astype(out_ref.dtype)


def _fused_call(params, ids, aux, B, S):
    kernel = functools.partial(_fused_forward_kernel, B=B, S=S)
    return pl.pallas_call(
        kernel,
        out_shape=jax.ShapeDtypeStruct((B, 128), jnp.float32),
        in_specs=[_VMEM()] * 6,
        out_specs=_VMEM(),
    )(ids, aux, params["mslab"], params["wslab"], params["w2slab"], params["bslab"])


# ------------------------------ parameters -----------------------------------
def init_params(key):
    def nrm(k, shape):
        return (0.02 * jax.random.normal(k, shape)).astype(jnp.float32)

    scale = 1.0 / (DH ** 0.5)   # attention scale, folded into the Q projection
    keys = iter(jax.random.split(key, 8 + LAYERS * 6))

    word_emb = nrm(next(keys), (VOCAB, H))
    pos_emb = nrm(next(keys), (MAX_POS, H))
    type_emb = nrm(next(keys), (TYPE_VOCAB, H))
    wp = nrm(next(keys), (H, H))
    wc = nrm(next(keys), (H, LABELS))

    # ---- misc / embedding slab: [MSLAB_ROWS, H] ----
    mslab = jnp.zeros((MSLAB_ROWS, H), jnp.float32)
    mslab = mslab.at[_OFF_WORD:_OFF_WORD + VOCAB].set(word_emb)
    mslab = mslab.at[_OFF_POS:_OFF_POS + MAX_POS].set(pos_emb)
    mslab = mslab.at[_OFF_TYPE:_OFF_TYPE + TYPE_VOCAB].set(type_emb)
    mslab = mslab.at[_OFF_ELNG].set(jnp.ones((H,), jnp.float32))   # LN gamma = 1
    # _OFF_ELNB / _OFF_BP / _OFF_BC rows stay zero (biases init to 0).
    mslab = mslab.at[_OFF_WP:_OFF_WP + H].set(wp)
    mslab = mslab.at[_OFF_WC:_OFF_WC + H, 0:LABELS].set(wc)

    # ---- per-layer slabs ----
    wslab = jnp.zeros((LAYERS, 3, H, 128), jnp.float32)   # wqkv | wo | w1 (lane 0-aligned)
    w2slab = jnp.zeros((LAYERS, FF, H), jnp.float32)
    bslab = jnp.zeros((LAYERS, 8, 128), jnp.float32)      # biases + LN params
    for l in range(LAYERS):
        wq = nrm(next(keys), (H, H)) * scale   # 1/sqrt(DH) folded in (equivalent
        wk = nrm(next(keys), (H, H))           # to scaling the attention scores)
        wv = nrm(next(keys), (H, H))
        wo = nrm(next(keys), (H, H))
        w1 = nrm(next(keys), (H, FF))
        w2 = nrm(next(keys), (FF, H))
        wslab = wslab.at[l, 0, :, :3 * H].set(jnp.concatenate([wq, wk, wv], axis=1))
        wslab = wslab.at[l, 1, :, :H].set(wo)
        wslab = wslab.at[l, 2, :, :FF].set(w1)
        w2slab = w2slab.at[l].set(w2)
        # biases (rows 0-3) stay zero; LayerNorm gammas = 1, betas = 0.
        bslab = bslab.at[l, _B_LN1G, :H].set(1.0)
        bslab = bslab.at[l, _B_LN2G, :H].set(1.0)

    return {"mslab": mslab, "wslab": wslab, "w2slab": w2slab, "bslab": bslab}


# ------------------------------ forward pass ----------------------------------
def model_forward(params, input_ids, token_type_ids, attention_mask, label=None):
    B, S = input_ids.shape
    # Tiny packing glue; everything else is one fused Pallas kernel.
    ids = jnp.concatenate(
        [input_ids.reshape(B * S, 1), token_type_ids.reshape(B * S, 1)],
        axis=1).astype(jnp.int32)                                   # [B*S, 2]
    mask_f = attention_mask.astype(jnp.float32)                     # [B, S]
    if label is not None:
        onehot = jax.nn.one_hot(label, LABELS, dtype=jnp.float32)   # [B, LABELS]
    else:
        onehot = jnp.zeros((B, LABELS), jnp.float32)
    aux = jnp.concatenate([mask_f, onehot], axis=1)                 # [B, S+LABELS]

    out = _fused_call(params, ids, aux, B, S)                       # [B, 128]
    logits = out[:, :LABELS]
    if label is not None:
        return logits, out[0, LABELS]
    return logits


# ---------------------------------- main --------------------------------------
if __name__ == "__main__":
    key = jax.random.PRNGKey(0)
    kp, kid, kmask, klab = jax.random.split(key, 4)

    B, S = 2, 8
    params = init_params(kp)
    input_ids = jax.random.randint(kid, (B, S), 0, VOCAB, dtype=jnp.int32)
    token_type_ids = jnp.zeros((B, S), dtype=jnp.int32)
    # mark the last 2 tokens of batch element 1 as padding
    attention_mask = jnp.ones((B, S), dtype=jnp.int32).at[1, -2:].set(0)
    label = jax.random.randint(klab, (B,), 0, LABELS, dtype=jnp.int32)

    fwd = jax.jit(model_forward)
    logits, loss = fwd(params, input_ids, token_type_ids, attention_mask, label)
    jax.block_until_ready((logits, loss))

    assert logits.shape == (B, LABELS)
    assert loss.shape == ()
    assert jnp.isfinite(loss)
    print("KERNEL_OK")
</pallas_src>

<mosaic_0001>
module attributes {stable_mosaic.version = 11 : i64} {
  func.func @_fused_forward_kernel(%arg0: memref<16x2xi32, #tpu.memory_space<vmem>>, %arg1: memref<2x10xf32, #tpu.memory_space<vmem>>, %arg2: memref<216x32xf32, #tpu.memory_space<vmem>>, %arg3: memref<2x3x32x128xf32, #tpu.memory_space<vmem>>, %arg4: memref<2x64x32xf32, #tpu.memory_space<vmem>>, %arg5: memref<2x8x128xf32, #tpu.memory_space<vmem>>, %arg6: memref<2x128xf32, #tpu.memory_space<vmem>>) attributes {dimension_semantics = [], scalar_prefetch = 0 : i64, scratch_operands = 0 : i64, tpu.core_type = #tpu.core_type<tc>} {
    %c0 = arith.constant 0 : index
    %c0_0 = arith.constant 0 : index
    %0 = vector.load %arg0[%c0, %c0_0] : memref<16x2xi32, #tpu.memory_space<vmem>>, vector<16x2xi32>
    %1 = vector.extract_strided_slice %0 {offsets = [0, 0], sizes = [16, 1], strides = [1, 1]} : vector<16x2xi32> to vector<16x1xi32>
    %2 = vector.extract_strided_slice %0 {offsets = [0, 1], sizes = [16, 1], strides = [1, 1]} : vector<16x2xi32> to vector<16x1xi32>
    %3 = tpu.iota {dimensions = array<i32: 1>} : vector<16x100xi32>
    %4 = vector.broadcast %1 : vector<16x1xi32> to vector<16x100xi32>
    %5 = arith.cmpi eq, %3, %4 : vector<16x100xi32>
    %6 = arith.extui %5 : vector<16x100xi1> to vector<16x100xi32>
    %7 = arith.sitofp %6 : vector<16x100xi32> to vector<16x100xf32>
    %c0_1 = arith.constant 0 : index
    %c0_2 = arith.constant 0 : index
    %8 = vector.load %arg2[%c0_1, %c0_2] : memref<216x32xf32, #tpu.memory_space<vmem>>, vector<100x32xf32>
    %cst = arith.constant dense<0.000000e+00> : vector<16x32xf32>
    %9 = tpu.matmul %7, %8, %cst {dimension_numbers = #tpu.dot_dimension_numbers<[1], [0], [0], [1], [0, 0, 1, 1], [], []>} : vector<16x100xf32>, vector<100x32xf32>, vector<16x32xf32> -> vector<16x32xf32>
    %c104 = arith.constant 104 : index
    %c0_3 = arith.constant 0 : index
    %10 = vector.load %arg2[%c104, %c0_3] : memref<216x32xf32, #tpu.memory_space<vmem>>, vector<8x32xf32>
    %11 = tpu.concatenate %10, %10 in 0 : vector<8x32xf32>, vector<8x32xf32> -> vector<16x32xf32>
    %12 = arith.addf %9, %11 : vector<16x32xf32>
    %13 = arith.sitofp %2 : vector<16x1xi32> to vector<16x1xf32>
    %c120 = arith.constant 120 : index
    %c0_4 = arith.constant 0 : index
    %14 = vector.load %arg2[%c120, %c0_4] : memref<216x32xf32, #tpu.memory_space<vmem>>, vector<1x32xf32>
    %c121 = arith.constant 121 : index
    %c0_5 = arith.constant 0 : index
    %15 = vector.load %arg2[%c121, %c0_5] : memref<216x32xf32, #tpu.memory_space<vmem>>, vector<1x32xf32>
    %cst_6 = arith.constant 1.000000e+00 : f32
    %16 = vector.broadcast %cst_6 : f32 to vector<16x1xf32>
    %17 = arith.subf %16, %13 : vector<16x1xf32>
    %18 = vector.broadcast %17 : vector<16x1xf32> to vector<16x32xf32>
    %19 = vector.broadcast %14 : vector<1x32xf32> to vector<16x32xf32>
    %20 = arith.mulf %18, %19 : vector<16x32xf32>
    %21 = arith.addf %12, %20 : vector<16x32xf32>
    %22 = vector.broadcast %13 : vector<16x1xf32> to vector<16x32xf32>
    %23 = vector.broadcast %15 : vector<1x32xf32> to vector<16x32xf32>
    %24 = arith.mulf %22, %23 : vector<16x32xf32>
    %25 = arith.addf %21, %24 : vector<16x32xf32>
    %c128 = arith.constant 128 : index
    %c0_7 = arith.constant 0 : index
    %26 = vector.load %arg2[%c128, %c0_7] : memref<216x32xf32, #tpu.memory_space<vmem>>, vector<1x32xf32>
    %c129 = arith.constant 129 : index
    %c0_8 = arith.constant 0 : index
    %27 = vector.load %arg2[%c129, %c0_8] : memref<216x32xf32, #tpu.memory_space<vmem>>, vector<1x32xf32>
    %cst_9 = arith.constant dense<0.000000e+00> : vector<16xf32>
    %28 = vector.multi_reduction <add>, %25, %cst_9 [1] : vector<16x32xf32> to vector<16xf32>
    %29 = vector.shape_cast %28 : vector<16xf32> to vector<16x1xf32>
    %cst_10 = arith.constant 3.200000e+01 : f32
    %30 = vector.broadcast %cst_10 : f32 to vector<16x1xf32>
    %31 = arith.divf %29, %30 : vector<16x1xf32>
    %32 = vector.broadcast %31 : vector<16x1xf32> to vector<16x32xf32>
    %33 = arith.subf %25, %32 : vector<16x32xf32>
    %34 = arith.mulf %33, %33 : vector<16x32xf32>
    %cst_11 = arith.constant dense<0.000000e+00> : vector<16xf32>
    %35 = vector.multi_reduction <add>, %34, %cst_11 [1] : vector<16x32xf32> to vector<16xf32>
    %36 = vector.shape_cast %35 : vector<16xf32> to vector<16x1xf32>
    %cst_12 = arith.constant 3.200000e+01 : f32
    %37 = vector.broadcast %cst_12 : f32 to vector<16x1xf32>
    %38 = arith.divf %36, %37 : vector<16x1xf32>
    %cst_13 = arith.constant 9.99999996E-13 : f32
    %39 = vector.broadcast %cst_13 : f32 to vector<16x1xf32>
    %40 = arith.addf %38, %39 : vector<16x1xf32>
    %41 = math.rsqrt %40 : vector<16x1xf32>
    %42 = vector.broadcast %41 : vector<16x1xf32> to vector<16x32xf32>
    %43 = arith.mulf %33, %42 : vector<16x32xf32>
    %44 = vector.broadcast %26 : vector<1x32xf32> to vector<16x32xf32>
    %45 = arith.mulf %43, %44 : vector<16x32xf32>
    %46 = vector.broadcast %27 : vector<1x32xf32> to vector<16x32xf32>
    %47 = arith.addf %45, %46 : vector<16x32xf32>
    %c0_14 = arith.constant 0 : index
    %c0_15 = arith.constant 0 : index
    %48 = vector.load %arg1[%c0_14, %c0_15] : memref<2x10xf32, #tpu.memory_space<vmem>>, vector<2x10xf32>
    %49 = vector.extract_strided_slice %48 {offsets = [0, 0], sizes = [2, 8], strides = [1, 1]} : vector<2x10xf32> to vector<2x8xf32>
    %cst_16 = arith.constant 1.000000e+00 : f32
    %50 = vector.broadcast %cst_16 : f32 to vector<2x8xf32>
    %51 = arith.subf %49, %50 : vector<2x8xf32>
    %cst_17 = arith.constant 1.000000e+09 : f32
    %52 = vector.broadcast %cst_17 : f32 to vector<2x8xf32>
    %53 = arith.mulf %51, %52 : vector<2x8xf32>
    %54 = vector.shape_cast %53 : vector<2x8xf32> to vector<2x1x8xf32>
    %c0_18 = arith.constant 0 : index
    %c0_19 = arith.constant 0 : index
    %c0_20 = arith.constant 0 : index
    %c0_21 = arith.constant 0 : index
    %55 = vector.load %arg3[%c0_18, %c0_19, %c0_20, %c0_21] : memref<2x3x32x128xf32, #tpu.memory_space<vmem>>, vector<1x3x32x128xf32>
    %56 = vector.shape_cast %55 : vector<1x3x32x128xf32> to vector<3x32x128xf32>
    %c0_22 = arith.constant 0 : index
    %c0_23 = arith.constant 0 : index
    %c0_24 = arith.constant 0 : index
    %57 = vector.load %arg5[%c0_22, %c0_23, %c0_24] : memref<2x8x128xf32, #tpu.memory_space<vmem>>, vector<1x8x128xf32>
    %58 = vector.shape_cast %57 : vector<1x8x128xf32> to vector<8x128xf32>
    %59 = vector.extract_strided_slice %56 {offsets = [0, 0, 0], sizes = [1, 32, 96], strides = [1, 1, 1]} : vector<3x32x128xf32> to vector<1x32x96xf32>
    %60 = vector.shape_cast %59 : vector<1x32x96xf32> to vector<32x96xf32>
    %61 = vector.extract_strided_slice %56 {offsets = [1, 0, 0], sizes = [1, 32, 32], strides = [1, 1, 1]} : vector<3x32x128xf32> to vector<1x32x32xf32>
    %62 = vector.shape_cast %61 : vector<1x32x32xf32> to vector<32x32xf32>
    %63 = vector.extract_strided_slice %56 {offsets = [2, 0, 0], sizes = [1, 32, 64], strides = [1, 1, 1]} : vector<3x32x128xf32> to vector<1x32x64xf32>
    %64 = vector.shape_cast %63 : vector<1x32x64xf32> to vector<32x64xf32>
    %c0_25 = arith.constant 0 : index
    %c0_26 = arith.constant 0 : index
    %c0_27 = arith.constant 0 : index
    %65 = vector.load %arg4[%c0_25, %c0_26, %c0_27] : memref<2x64x32xf32, #tpu.memory_space<vmem>>, vector<1x64x32xf32>
    %66 = vector.shape_cast %65 : vector<1x64x32xf32> to vector<64x32xf32>
    %cst_28 = arith.constant dense<0.000000e+00> : vector<16x96xf32>
    %67 = tpu.matmul %47, %60, %cst_28 {dimension_numbers = #tpu.dot_dimension_numbers<[1], [0], [0], [1], [0, 0, 1, 1], [], []>} : vector<16x32xf32>, vector<32x96xf32>, vector<16x96xf32> -> vector<16x96xf32>
    %68 = vector.extract_strided_slice %58 {offsets = [0, 0], sizes = [1, 96], strides = [1, 1]} : vector<8x128xf32> to vector<1x96xf32>
    %69 = vector.broadcast %68 : vector<1x96xf32> to vector<16x96xf32>
    %70 = arith.addf %67, %69 : vector<16x96xf32>
    %71 = vector.extract_strided_slice %70 {offsets = [0, 0], sizes = [16, 32], strides = [1, 1]} : vector<16x96xf32> to vector<16x32xf32>
    %72 = vector.shape_cast %71 : vector<16x32xf32> to vector<2x8x32xf32>
    %73 = vector.extract_strided_slice %70 {offsets = [0, 32], sizes = [16, 32], strides = [1, 1]} : vector<16x96xf32> to vector<16x32xf32>
    %74 = vector.shape_cast %73 : vector<16x32xf32> to vector<2x8x32xf32>
    %75 = vector.extract_strided_slice %70 {offsets = [0, 64], sizes = [16, 32], strides = [1, 1]} : vector<16x96xf32> to vector<16x32xf32>
    %76 = vector.shape_cast %75 : vector<16x32xf32> to vector<2x8x32xf32>
    %77 = vector.extract_strided_slice %72 {offsets = [0, 0, 0], sizes = [2, 8, 16], strides = [1, 1, 1]} : vector<2x8x32xf32> to vector<2x8x16xf32>
    %78 = vector.extract_strided_slice %74 {offsets = [0, 0, 0], sizes = [2, 8, 16], strides = [1, 1, 1]} : vector<2x8x32xf32> to vector<2x8x16xf32>
    "tpu.trace_start"() <{level = 10 : i32, message = "bqd,bkd->bqk"}> : () -> ()
    %cst_29 = arith.constant dense<0.000000e+00> : vector<2x8x8xf32>
    %79 = tpu.matmul %77, %78, %cst_29 {dimension_numbers = #tpu.dot_dimension_numbers<[2], [2], [1], [1], [0, 0, 0, 1, 1, 1], [0], [0]>} : vector<2x8x16xf32>, vector<2x8x16xf32>, vector<2x8x8xf32> -> vector<2x8x8xf32>
    "tpu.trace_stop"() : () -> ()
    %80 = vector.broadcast %54 : vector<2x1x8xf32> to vector<2x8x8xf32>
    %81 = arith.addf %79, %80 : vector<2x8x8xf32>
    %82 = math.exp %81 : vector<2x8x8xf32>
    %cst_30 = arith.constant dense<0.000000e+00> : vector<2x8xf32>
    %83 = vector.multi_reduction <add>, %82, %cst_30 [2] : vector<2x8x8xf32> to vector<2x8xf32>
    %84 = vector.shape_cast %83 : vector<2x8xf32> to vector<2x8x1xf32>
    %85 = tpu.reciprocal %84 {approx = true} : vector<2x8x1xf32> -> vector<2x8x1xf32>
    %86 = vector.broadcast %85 : vector<2x8x1xf32> to vector<2x8x8xf32>
    %87 = arith.mulf %82, %86 : vector<2x8x8xf32>
    %88 = vector.extract_strided_slice %76 {offsets = [0, 0, 0], sizes = [2, 8, 16], strides = [1, 1, 1]} : vector<2x8x32xf32> to vector<2x8x16xf32>
    "tpu.trace_start"() <{level = 10 : i32, message = "bqk,bkd->bqd"}> : () -> ()
    %cst_31 = arith.constant dense<0.000000e+00> : vector<2x8x16xf32>
    %89 = tpu.matmul %87, %88, %cst_31 {dimension_numbers = #tpu.dot_dimension_numbers<[2], [1], [1], [2], [0, 0, 0, 1, 1, 2], [0], [0]>} : vector<2x8x8xf32>, vector<2x8x16xf32>, vector<2x8x16xf32> -> vector<2x8x16xf32>
    "tpu.trace_stop"() : () -> ()
    %90 = vector.extract_strided_slice %72 {offsets = [0, 0, 16], sizes = [2, 8, 16], strides = [1, 1, 1]} : vector<2x8x32xf32> to vector<2x8x16xf32>
    %91 = vector.extract_strided_slice %74 {offsets = [0, 0, 16], sizes = [2, 8, 16], strides = [1, 1, 1]} : vector<2x8x32xf32> to vector<2x8x16xf32>
    "tpu.trace_start"() <{level = 10 : i32, message = "bqd,bkd->bqk"}> : () -> ()
    %cst_32 = arith.constant dense<0.000000e+00> : vector<2x8x8xf32>
    %92 = tpu.matmul %90, %91, %cst_32 {dimension_numbers = #tpu.dot_dimension_numbers<[2], [2], [1], [1], [0, 0, 0, 1, 1, 1], [0], [0]>} : vector<2x8x16xf32>, vector<2x8x16xf32>, vector<2x8x8xf32> -> vector<2x8x8xf32>
    "tpu.trace_stop"() : () -> ()
    %93 = vector.broadcast %54 : vector<2x1x8xf32> to vector<2x8x8xf32>
    %94 = arith.addf %92, %93 : vector<2x8x8xf32>
    %95 = math.exp %94 : vector<2x8x8xf32>
    %cst_33 = arith.constant dense<0.000000e+00> : vector<2x8xf32>
    %96 = vector.multi_reduction <add>, %95, %cst_33 [2] : vector<2x8x8xf32> to vector<2x8xf32>
    %97 = vector.shape_cast %96 : vector<2x8xf32> to vector<2x8x1xf32>
    %98 = tpu.reciprocal %97 {approx = true} : vector<2x8x1xf32> -> vector<2x8x1xf32>
    %99 = vector.broadcast %98 : vector<2x8x1xf32> to vector<2x8x8xf32>
    %100 = arith.mulf %95, %99 : vector<2x8x8xf32>
    %101 = vector.extract_strided_slice %76 {offsets = [0, 0, 16], sizes = [2, 8, 16], strides = [1, 1, 1]} : vector<2x8x32xf32> to vector<2x8x16xf32>
    "tpu.trace_start"() <{level = 10 : i32, message = "bqk,bkd->bqd"}> : () -> ()
    %cst_34 = arith.constant dense<0.000000e+00> : vector<2x8x16xf32>
    %102 = tpu.matmul %100, %101, %cst_34 {dimension_numbers = #tpu.dot_dimension_numbers<[2], [1], [1], [2], [0, 0, 0, 1, 1, 2], [0], [0]>} : vector<2x8x8xf32>, vector<2x8x16xf32>, vector<2x8x16xf32> -> vector<2x8x16xf32>
    "tpu.trace_stop"() : () -> ()
    %103 = tpu.concatenate %89, %102 in 2 : vector<2x8x16xf32>, vector<2x8x16xf32> -> vector<2x8x32xf32>
    %104 = vector.shape_cast %103 : vector<2x8x32xf32> to vector<16x32xf32>
    %cst_35 = arith.constant dense<0.000000e+00> : vector<16x32xf32>
    %105 = tpu.matmul %104, %62, %cst_35 {dimension_numbers = #tpu.dot_dimension_numbers<[1], [0], [0], [1], [0, 0, 1, 1], [], []>} : vector<16x32xf32>, vector<32x32xf32>, vector<16x32xf32> -> vector<16x32xf32>
    %106 = vector.extract_strided_slice %58 {offsets = [1, 0], sizes = [1, 32], strides = [1, 1]} : vector<8x128xf32> to vector<1x32xf32>
    %107 = vector.broadcast %106 : vector<1x32xf32> to vector<16x32xf32>
    %108 = arith.addf %105, %107 : vector<16x32xf32>
    %109 = arith.addf %47, %108 : vector<16x32xf32>
    %110 = vector.extract_strided_slice %58 {offsets = [4, 0], sizes = [1, 32], strides = [1, 1]} : vector<8x128xf32> to vector<1x32xf32>
    %111 = vector.extract_strided_slice %58 {offsets = [5, 0], sizes = [1, 32], strides = [1, 1]} : vector<8x128xf32> to vector<1x32xf32>
    %cst_36 = arith.constant dense<0.000000e+00> : vector<16xf32>
    %112 = vector.multi_reduction <add>, %109, %cst_36 [1] : vector<16x32xf32> to vector<16xf32>
    %113 = vector.shape_cast %112 : vector<16xf32> to vector<16x1xf32>
    %cst_37 = arith.constant 3.200000e+01 : f32
    %114 = vector.broadcast %cst_37 : f32 to vector<16x1xf32>
    %115 = arith.divf %113, %114 : vector<16x1xf32>
    %116 = vector.broadcast %115 : vector<16x1xf32> to vector<16x32xf32>
    %117 = arith.subf %109, %116 : vector<16x32xf32>
    %118 = arith.mulf %117, %117 : vector<16x32xf32>
    %cst_38 = arith.constant dense<0.000000e+00> : vector<16xf32>
    %119 = vector.multi_reduction <add>, %118, %cst_38 [1] : vector<16x32xf32> to vector<16xf32>
    %120 = vector.shape_cast %119 : vector<16xf32> to vector<16x1xf32>
    %cst_39 = arith.constant 3.200000e+01 : f32
    %121 = vector.broadcast %cst_39 : f32 to vector<16x1xf32>
    %122 = arith.divf %120, %121 : vector<16x1xf32>
    %cst_40 = arith.constant 9.99999996E-13 : f32
    %123 = vector.broadcast %cst_40 : f32 to vector<16x1xf32>
    %124 = arith.addf %122, %123 : vector<16x1xf32>
    %125 = math.rsqrt %124 : vector<16x1xf32>
    %126 = vector.broadcast %125 : vector<16x1xf32> to vector<16x32xf32>
    %127 = arith.mulf %117, %126 : vector<16x32xf32>
    %128 = vector.broadcast %110 : vector<1x32xf32> to vector<16x32xf32>
    %129 = arith.mulf %127, %128 : vector<16x32xf32>
    %130 = vector.broadcast %111 : vector<1x32xf32> to vector<16x32xf32>
    %131 = arith.addf %129, %130 : vector<16x32xf32>
    %cst_41 = arith.constant dense<0.000000e+00> : vector<16x64xf32>
    %132 = tpu.matmul %131, %64, %cst_41 {dimension_numbers = #tpu.dot_dimension_numbers<[1], [0], [0], [1], [0, 0, 1, 1], [], []>} : vector<16x32xf32>, vector<32x64xf32>, vector<16x64xf32> -> vector<16x64xf32>
    %133 = vector.extract_strided_slice %58 {offsets = [2, 0], sizes = [1, 64], strides = [1, 1]} : vector<8x128xf32> to vector<1x64xf32>
    %134 = vector.broadcast %133 : vector<1x64xf32> to vector<16x64xf32>
    %135 = arith.addf %132, %134 : vector<16x64xf32>
    %cst_42 = arith.constant 5.000000e-01 : f32
    %136 = vector.broadcast %cst_42 : f32 to vector<16x64xf32>
    %137 = arith.mulf %136, %135 : vector<16x64xf32>
    %cst_43 = arith.constant 4.471500e-02 : f32
    %138 = vector.broadcast %cst_43 : f32 to vector<16x64xf32>
    %139 = arith.mulf %138, %135 : vector<16x64xf32>
    %140 = arith.mulf %139, %135 : vector<16x64xf32>
    %141 = arith.mulf %140, %135 : vector<16x64xf32>
    %142 = arith.addf %135, %141 : vector<16x64xf32>
    %cst_44 = arith.constant 0.797884583 : f32
    %143 = vector.broadcast %cst_44 : f32 to vector<16x64xf32>
    %144 = arith.mulf %143, %142 : vector<16x64xf32>
    %145 = math.tanh %144 : vector<16x64xf32>
    %cst_45 = arith.constant 1.000000e+00 : f32
    %146 = vector.broadcast %cst_45 : f32 to vector<16x64xf32>
    %147 = arith.addf %146, %145 : vector<16x64xf32>
    %148 = arith.mulf %137, %147 : vector<16x64xf32>
    %cst_46 = arith.constant dense<0.000000e+00> : vector<16x32xf32>
    %149 = tpu.matmul %148, %66, %cst_46 {dimension_numbers = #tpu.dot_dimension_numbers<[1], [0], [0], [1], [0, 0, 1, 1], [], []>} : vector<16x64xf32>, vector<64x32xf32>, vector<16x32xf32> -> vector<16x32xf32>
    %150 = vector.extract_strided_slice %58 {offsets = [3, 0], sizes = [1, 32], strides = [1, 1]} : vector<8x128xf32> to vector<1x32xf32>
    %151 = vector.broadcast %150 : vector<1x32xf32> to vector<16x32xf32>
    %152 = arith.addf %149, %151 : vector<16x32xf32>
    %153 = arith.addf %131, %152 : vector<16x32xf32>
    %154 = vector.extract_strided_slice %58 {offsets = [6, 0], sizes = [1, 32], strides = [1, 1]} : vector<8x128xf32> to vector<1x32xf32>
    %155 = vector.extract_strided_slice %58 {offsets = [7, 0], sizes = [1, 32], strides = [1, 1]} : vector<8x128xf32> to vector<1x32xf32>
    %cst_47 = arith.constant dense<0.000000e+00> : vector<16xf32>
    %156 = vector.multi_reduction <add>, %153, %cst_47 [1] : vector<16x32xf32> to vector<16xf32>
    %157 = vector.shape_cast %156 : vector<16xf32> to vector<16x1xf32>
    %cst_48 = arith.constant 3.200000e+01 : f32
    %158 = vector.broadcast %cst_48 : f32 to vector<16x1xf32>
    %159 = arith.divf %157, %158 : vector<16x1xf32>
    %160 = vector.broadcast %159 : vector<16x1xf32> to vector<16x32xf32>
    %161 = arith.subf %153, %160 : vector<16x32xf32>
    %162 = arith.mulf %161, %161 : vector<16x32xf32>
    %cst_49 = arith.constant dense<0.000000e+00> : vector<16xf32>
    %163 = vector.multi_reduction <add>, %162, %cst_49 [1] : vector<16x32xf32> to vector<16xf32>
    %164 = vector.shape_cast %163 : vector<16xf32> to vector<16x1xf32>
    %cst_50 = arith.constant 3.200000e+01 : f32
    %165 = vector.broadcast %cst_50 : f32 to vector<16x1xf32>
    %166 = arith.divf %164, %165 : vector<16x1xf32>
    %cst_51 = arith.constant 9.99999996E-13 : f32
    %167 = vector.broadcast %cst_51 : f32 to vector<16x1xf32>
    %168 = arith.addf %166, %167 : vector<16x1xf32>
    %169 = math.rsqrt %168 : vector<16x1xf32>
    %170 = vector.broadcast %169 : vector<16x1xf32> to vector<16x32xf32>
    %171 = arith.mulf %161, %170 : vector<16x32xf32>
    %172 = vector.broadcast %154 : vector<1x32xf32> to vector<16x32xf32>
    %173 = arith.mulf %171, %172 : vector<16x32xf32>
    %174 = vector.broadcast %155 : vector<1x32xf32> to vector<16x32xf32>
    %175 = arith.addf %173, %174 : vector<16x32xf32>
    %c1 = arith.constant 1 : index
    %c0_52 = arith.constant 0 : index
    %c0_53 = arith.constant 0 : index
    %c0_54 = arith.constant 0 : index
    %176 = vector.load %arg3[%c1, %c0_52, %c0_53, %c0_54] : memref<2x3x32x128xf32, #tpu.memory_space<vmem>>, vector<1x3x32x128xf32>
    %177 = vector.shape_cast %176 : vector<1x3x32x128xf32> to vector<3x32x128xf32>
    %c1_55 = arith.constant 1 : index
    %c0_56 = arith.constant 0 : index
    %c0_57 = arith.constant 0 : index
    %178 = vector.load %arg5[%c1_55, %c0_56, %c0_57] : memref<2x8x128xf32, #tpu.memory_space<vmem>>, vector<1x8x128xf32>
    %179 = vector.shape_cast %178 : vector<1x8x128xf32> to vector<8x128xf32>
    %180 = vector.extract_strided_slice %177 {offsets = [0, 0, 0], sizes = [1, 32, 96], strides = [1, 1, 1]} : vector<3x32x128xf32> to vector<1x32x96xf32>
    %181 = vector.shape_cast %180 : vector<1x32x96xf32> to vector<32x96xf32>
    %182 = vector.extract_strided_slice %177 {offsets = [1, 0, 0], sizes = [1, 32, 32], strides = [1, 1, 1]} : vector<3x32x128xf32> to vector<1x32x32xf32>
    %183 = vector.shape_cast %182 : vector<1x32x32xf32> to vector<32x32xf32>
    %184 = vector.extract_strided_slice %177 {offsets = [2, 0, 0], sizes = [1, 32, 64], strides = [1, 1, 1]} : vector<3x32x128xf32> to vector<1x32x64xf32>
    %185 = vector.shape_cast %184 : vector<1x32x64xf32> to vector<32x64xf32>
    %c1_58 = arith.constant 1 : index
    %c0_59 = arith.constant 0 : index
    %c0_60 = arith.constant 0 : index
    %186 = vector.load %arg4[%c1_58, %c0_59, %c0_60] : memref<2x64x32xf32, #tpu.memory_space<vmem>>, vector<1x64x32xf32>
    %187 = vector.shape_cast %186 : vector<1x64x32xf32> to vector<64x32xf32>
    %cst_61 = arith.constant dense<0.000000e+00> : vector<16x96xf32>
    %188 = tpu.matmul %175, %181, %cst_61 {dimension_numbers = #tpu.dot_dimension_numbers<[1], [0], [0], [1], [0, 0, 1, 1], [], []>} : vector<16x32xf32>, vector<32x96xf32>, vector<16x96xf32> -> vector<16x96xf32>
    %189 = vector.extract_strided_slice %179 {offsets = [0, 0], sizes = [1, 96], strides = [1, 1]} : vector<8x128xf32> to vector<1x96xf32>
    %190 = vector.broadcast %189 : vector<1x96xf32> to vector<16x96xf32>
    %191 = arith.addf %188, %190 : vector<16x96xf32>
    %192 = vector.extract_strided_slice %191 {offsets = [0, 0], sizes = [16, 32], strides = [1, 1]} : vector<16x96xf32> to vector<16x32xf32>
    %193 = vector.shape_cast %192 : vector<16x32xf32> to vector<2x8x32xf32>
    %194 = vector.extract_strided_slice %191 {offsets = [0, 32], sizes = [16, 32], strides = [1, 1]} : vector<16x96xf32> to vector<16x32xf32>
    %195 = vector.shape_cast %194 : vector<16x32xf32> to vector<2x8x32xf32>
    %196 = vector.extract_strided_slice %191 {offsets = [0, 64], sizes = [16, 32], strides = [1, 1]} : vector<16x96xf32> to vector<16x32xf32>
    %197 = vector.shape_cast %196 : vector<16x32xf32> to vector<2x8x32xf32>
    %198 = vector.extract_strided_slice %193 {offsets = [0, 0, 0], sizes = [2, 8, 16], strides = [1, 1, 1]} : vector<2x8x32xf32> to vector<2x8x16xf32>
    %199 = vector.extract_strided_slice %195 {offsets = [0, 0, 0], sizes = [2, 8, 16], strides = [1, 1, 1]} : vector<2x8x32xf32> to vector<2x8x16xf32>
    "tpu.trace_start"() <{level = 10 : i32, message = "bqd,bkd->bqk"}> : () -> ()
    %cst_62 = arith.constant dense<0.000000e+00> : vector<2x8x8xf32>
    %200 = tpu.matmul %198, %199, %cst_62 {dimension_numbers = #tpu.dot_dimension_numbers<[2], [2], [1], [1], [0, 0, 0, 1, 1, 1], [0], [0]>} : vector<2x8x16xf32>, vector<2x8x16xf32>, vector<2x8x8xf32> -> vector<2x8x8xf32>
    "tpu.trace_stop"() : () -> ()
    %201 = vector.broadcast %54 : vector<2x1x8xf32> to vector<2x8x8xf32>
    %202 = arith.addf %200, %201 : vector<2x8x8xf32>
    %203 = math.exp %202 : vector<2x8x8xf32>
    %cst_63 = arith.constant dense<0.000000e+00> : vector<2x8xf32>
    %204 = vector.multi_reduction <add>, %203, %cst_63 [2] : vector<2x8x8xf32> to vector<2x8xf32>
    %205 = vector.shape_cast %204 : vector<2x8xf32> to vector<2x8x1xf32>
    %206 = tpu.reciprocal %205 {approx = true} : vector<2x8x1xf32> -> vector<2x8x1xf32>
    %207 = vector.broadcast %206 : vector<2x8x1xf32> to vector<2x8x8xf32>
    %208 = arith.mulf %203, %207 : vector<2x8x8xf32>
    %209 = vector.extract_strided_slice %197 {offsets = [0, 0, 0], sizes = [2, 8, 16], strides = [1, 1, 1]} : vector<2x8x32xf32> to vector<2x8x16xf32>
    "tpu.trace_start"() <{level = 10 : i32, message = "bqk,bkd->bqd"}> : () -> ()
    %cst_64 = arith.constant dense<0.000000e+00> : vector<2x8x16xf32>
    %210 = tpu.matmul %208, %209, %cst_64 {dimension_numbers = #tpu.dot_dimension_numbers<[2], [1], [1], [2], [0, 0, 0, 1, 1, 2], [0], [0]>} : vector<2x8x8xf32>, vector<2x8x16xf32>, vector<2x8x16xf32> -> vector<2x8x16xf32>
    "tpu.trace_stop"() : () -> ()
    %211 = vector.extract_strided_slice %193 {offsets = [0, 0, 16], sizes = [2, 8, 16], strides = [1, 1, 1]} : vector<2x8x32xf32> to vector<2x8x16xf32>
    %212 = vector.extract_strided_slice %195 {offsets = [0, 0, 16], sizes = [2, 8, 16], strides = [1, 1, 1]} : vector<2x8x32xf32> to vector<2x8x16xf32>
    "tpu.trace_start"() <{level = 10 : i32, message = "bqd,bkd->bqk"}> : () -> ()
    %cst_65 = arith.constant dense<0.000000e+00> : vector<2x8x8xf32>
    %213 = tpu.matmul %211, %212, %cst_65 {dimension_numbers = #tpu.dot_dimension_numbers<[2], [2], [1], [1], [0, 0, 0, 1, 1, 1], [0], [0]>} : vector<2x8x16xf32>, vector<2x8x16xf32>, vector<2x8x8xf32> -> vector<2x8x8xf32>
    "tpu.trace_stop"() : () -> ()
    %214 = vector.broadcast %54 : vector<2x1x8xf32> to vector<2x8x8xf32>
    %215 = arith.addf %213, %214 : vector<2x8x8xf32>
    %216 = math.exp %215 : vector<2x8x8xf32>
    %cst_66 = arith.constant dense<0.000000e+00> : vector<2x8xf32>
    %217 = vector.multi_reduction <add>, %216, %cst_66 [2] : vector<2x8x8xf32> to vector<2x8xf32>
    %218 = vector.shape_cast %217 : vector<2x8xf32> to vector<2x8x1xf32>
    %219 = tpu.reciprocal %218 {approx = true} : vector<2x8x1xf32> -> vector<2x8x1xf32>
    %220 = vector.broadcast %219 : vector<2x8x1xf32> to vector<2x8x8xf32>
    %221 = arith.mulf %216, %220 : vector<2x8x8xf32>
    %222 = vector.extract_strided_slice %197 {offsets = [0, 0, 16], sizes = [2, 8, 16], strides = [1, 1, 1]} : vector<2x8x32xf32> to vector<2x8x16xf32>
    "tpu.trace_start"() <{level = 10 : i32, message = "bqk,bkd->bqd"}> : () -> ()
    %cst_67 = arith.constant dense<0.000000e+00> : vector<2x8x16xf32>
    %223 = tpu.matmul %221, %222, %cst_67 {dimension_numbers = #tpu.dot_dimension_numbers<[2], [1], [1], [2], [0, 0, 0, 1, 1, 2], [0], [0]>} : vector<2x8x8xf32>, vector<2x8x16xf32>, vector<2x8x16xf32> -> vector<2x8x16xf32>
    "tpu.trace_stop"() : () -> ()
    %224 = tpu.concatenate %210, %223 in 2 : vector<2x8x16xf32>, vector<2x8x16xf32> -> vector<2x8x32xf32>
    %225 = vector.shape_cast %224 : vector<2x8x32xf32> to vector<16x32xf32>
    %cst_68 = arith.constant dense<0.000000e+00> : vector<16x32xf32>
    %226 = tpu.matmul %225, %183, %cst_68 {dimension_numbers = #tpu.dot_dimension_numbers<[1], [0], [0], [1], [0, 0, 1, 1], [], []>} : vector<16x32xf32>, vector<32x32xf32>, vector<16x32xf32> -> vector<16x32xf32>
    %227 = vector.extract_strided_slice %179 {offsets = [1, 0], sizes = [1, 32], strides = [1, 1]} : vector<8x128xf32> to vector<1x32xf32>
    %228 = vector.broadcast %227 : vector<1x32xf32> to vector<16x32xf32>
    %229 = arith.addf %226, %228 : vector<16x32xf32>
    %230 = arith.addf %175, %229 : vector<16x32xf32>
    %231 = vector.extract_strided_slice %179 {offsets = [4, 0], sizes = [1, 32], strides = [1, 1]} : vector<8x128xf32> to vector<1x32xf32>
    %232 = vector.extract_strided_slice %179 {offsets = [5, 0], sizes = [1, 32], strides = [1, 1]} : vector<8x128xf32> to vector<1x32xf32>
    %cst_69 = arith.constant dense<0.000000e+00> : vector<16xf32>
    %233 = vector.multi_reduction <add>, %230, %cst_69 [1] : vector<16x32xf32> to vector<16xf32>
    %234 = vector.shape_cast %233 : vector<16xf32> to vector<16x1xf32>
    %cst_70 = arith.constant 3.200000e+01 : f32
    %235 = vector.broadcast %cst_70 : f32 to vector<16x1xf32>
    %236 = arith.divf %234, %235 : vector<16x1xf32>
    %237 = vector.broadcast %236 : vector<16x1xf32> to vector<16x32xf32>
    %238 = arith.subf %230, %237 : vector<16x32xf32>
    %239 = arith.mulf %238, %238 : vector<16x32xf32>
    %cst_71 = arith.constant dense<0.000000e+00> : vector<16xf32>
    %240 = vector.multi_reduction <add>, %239, %cst_71 [1] : vector<16x32xf32> to vector<16xf32>
    %241 = vector.shape_cast %240 : vector<16xf32> to vector<16x1xf32>
    %cst_72 = arith.constant 3.200000e+01 : f32
    %242 = vector.broadcast %cst_72 : f32 to vector<16x1xf32>
    %243 = arith.divf %241, %242 : vector<16x1xf32>
    %cst_73 = arith.constant 9.99999996E-13 : f32
    %244 = vector.broadcast %cst_73 : f32 to vector<16x1xf32>
    %245 = arith.addf %243, %244 : vector<16x1xf32>
    %246 = math.rsqrt %245 : vector<16x1xf32>
    %247 = vector.broadcast %246 : vector<16x1xf32> to vector<16x32xf32>
    %248 = arith.mulf %238, %247 : vector<16x32xf32>
    %249 = vector.broadcast %231 : vector<1x32xf32> to vector<16x32xf32>
    %250 = arith.mulf %248, %249 : vector<16x32xf32>
    %251 = vector.broadcast %232 : vector<1x32xf32> to vector<16x32xf32>
    %252 = arith.addf %250, %251 : vector<16x32xf32>
    %cst_74 = arith.constant dense<0.000000e+00> : vector<16x64xf32>
    %253 = tpu.matmul %252, %185, %cst_74 {dimension_numbers = #tpu.dot_dimension_numbers<[1], [0], [0], [1], [0, 0, 1, 1], [], []>} : vector<16x32xf32>, vector<32x64xf32>, vector<16x64xf32> -> vector<16x64xf32>
    %254 = vector.extract_strided_slice %179 {offsets = [2, 0], sizes = [1, 64], strides = [1, 1]} : vector<8x128xf32> to vector<1x64xf32>
    %255 = vector.broadcast %254 : vector<1x64xf32> to vector<16x64xf32>
    %256 = arith.addf %253, %255 : vector<16x64xf32>
    %cst_75 = arith.constant 5.000000e-01 : f32
    %257 = vector.broadcast %cst_75 : f32 to vector<16x64xf32>
    %258 = arith.mulf %257, %256 : vector<16x64xf32>
    %cst_76 = arith.constant 4.471500e-02 : f32
    %259 = vector.broadcast %cst_76 : f32 to vector<16x64xf32>
    %260 = arith.mulf %259, %256 : vector<16x64xf32>
    %261 = arith.mulf %260, %256 : vector<16x64xf32>
    %262 = arith.mulf %261, %256 : vector<16x64xf32>
    %263 = arith.addf %256, %262 : vector<16x64xf32>
    %cst_77 = arith.constant 0.797884583 : f32
    %264 = vector.broadcast %cst_77 : f32 to vector<16x64xf32>
    %265 = arith.mulf %264, %263 : vector<16x64xf32>
    %266 = math.tanh %265 : vector<16x64xf32>
    %cst_78 = arith.constant 1.000000e+00 : f32
    %267 = vector.broadcast %cst_78 : f32 to vector<16x64xf32>
    %268 = arith.addf %267, %266 : vector<16x64xf32>
    %269 = arith.mulf %258, %268 : vector<16x64xf32>
    %cst_79 = arith.constant dense<0.000000e+00> : vector<16x32xf32>
    %270 = tpu.matmul %269, %187, %cst_79 {dimension_numbers = #tpu.dot_dimension_numbers<[1], [0], [0], [1], [0, 0, 1, 1], [], []>} : vector<16x64xf32>, vector<64x32xf32>, vector<16x32xf32> -> vector<16x32xf32>
    %271 = vector.extract_strided_slice %179 {offsets = [3, 0], sizes = [1, 32], strides = [1, 1]} : vector<8x128xf32> to vector<1x32xf32>
    %272 = vector.broadcast %271 : vector<1x32xf32> to vector<16x32xf32>
    %273 = arith.addf %270, %272 : vector<16x32xf32>
    %274 = arith.addf %252, %273 : vector<16x32xf32>
    %275 = vector.extract_strided_slice %179 {offsets = [6, 0], sizes = [1, 32], strides = [1, 1]} : vector<8x128xf32> to vector<1x32xf32>
    %276 = vector.extract_strided_slice %179 {offsets = [7, 0], sizes = [1, 32], strides = [1, 1]} : vector<8x128xf32> to vector<1x32xf32>
    %cst_80 = arith.constant dense<0.000000e+00> : vector<16xf32>
    %277 = vector.multi_reduction <add>, %274, %cst_80 [1] : vector<16x32xf32> to vector<16xf32>
    %278 = vector.shape_cast %277 : vector<16xf32> to vector<16x1xf32>
    %cst_81 = arith.constant 3.200000e+01 : f32
    %279 = vector.broadcast %cst_81 : f32 to vector<16x1xf32>
    %280 = arith.divf %278, %279 : vector<16x1xf32>
    %281 = vector.broadcast %280 : vector<16x1xf32> to vector<16x32xf32>
    %282 = arith.subf %274, %281 : vector<16x32xf32>
    %283 = arith.mulf %282, %282 : vector<16x32xf32>
    %cst_82 = arith.constant dense<0.000000e+00> : vector<16xf32>
    %284 = vector.multi_reduction <add>, %283, %cst_82 [1] : vector<16x32xf32> to vector<16xf32>
    %285 = vector.shape_cast %284 : vector<16xf32> to vector<16x1xf32>
    %cst_83 = arith.constant 3.200000e+01 : f32
    %286 = vector.broadcast %cst_83 : f32 to vector<16x1xf32>
    %287 = arith.divf %285, %286 : vector<16x1xf32>
    %cst_84 = arith.constant 9.99999996E-13 : f32
    %288 = vector.broadcast %cst_84 : f32 to vector<16x1xf32>
    %289 = arith.addf %287, %288 : vector<16x1xf32>
    %290 = math.rsqrt %289 : vector<16x1xf32>
    %291 = vector.broadcast %290 : vector<16x1xf32> to vector<16x32xf32>
    %292 = arith.mulf %282, %291 : vector<16x32xf32>
    %293 = vector.broadcast %275 : vector<1x32xf32> to vector<16x32xf32>
    %294 = arith.mulf %292, %293 : vector<16x32xf32>
    %295 = vector.broadcast %276 : vector<1x32xf32> to vector<16x32xf32>
    %296 = arith.addf %294, %295 : vector<16x32xf32>
    %297 = vector.shape_cast %296 : vector<16x32xf32> to vector<2x8x32xf32>
    %298 = vector.extract_strided_slice %297 {offsets = [0, 0, 0], sizes = [2, 1, 32], strides = [1, 1, 1]} : vector<2x8x32xf32> to vector<2x1x32xf32>
    %299 = vector.shape_cast %298 : vector<2x1x32xf32> to vector<2x32xf32>
    %c136 = arith.constant 136 : index
    %c0_85 = arith.constant 0 : index
    %300 = vector.load %arg2[%c136, %c0_85] : memref<216x32xf32, #tpu.memory_space<vmem>>, vector<32x32xf32>
    %c168 = arith.constant 168 : index
    %c0_86 = arith.constant 0 : index
    %301 = vector.load %arg2[%c168, %c0_86] : memref<216x32xf32, #tpu.memory_space<vmem>>, vector<1x32xf32>
    %c176 = arith.constant 176 : index
    %c0_87 = arith.constant 0 : index
    %302 = vector.load %arg2[%c176, %c0_87] : memref<216x32xf32, #tpu.memory_space<vmem>>, vector<32x32xf32>
    %c208 = arith.constant 208 : index
    %c0_88 = arith.constant 0 : index
    %303 = vector.load %arg2[%c208, %c0_88] : memref<216x32xf32, #tpu.memory_space<vmem>>, vector<1x32xf32>
    %cst_89 = arith.constant dense<0.000000e+00> : vector<2x32xf32>
    %304 = tpu.matmul %299, %300, %cst_89 {dimension_numbers = #tpu.dot_dimension_numbers<[1], [0], [0], [1], [0, 0, 1, 1], [], []>} : vector<2x32xf32>, vector<32x32xf32>, vector<2x32xf32> -> vector<2x32xf32>
    %305 = vector.broadcast %301 : vector<1x32xf32> to vector<2x32xf32>
    %306 = arith.addf %304, %305 : vector<2x32xf32>
    %307 = math.tanh %306 : vector<2x32xf32>
    %cst_90 = arith.constant dense<0.000000e+00> : vector<2x32xf32>
    %308 = tpu.matmul %307, %302, %cst_90 {dimension_numbers = #tpu.dot_dimension_numbers<[1], [0], [0], [1], [0, 0, 1, 1], [], []>} : vector<2x32xf32>, vector<32x32xf32>, vector<2x32xf32> -> vector<2x32xf32>
    %309 = vector.broadcast %303 : vector<1x32xf32> to vector<2x32xf32>
    %310 = arith.addf %308, %309 : vector<2x32xf32>
    %311 = vector.extract_strided_slice %310 {offsets = [0, 0], sizes = [2, 2], strides = [1, 1]} : vector<2x32xf32> to vector<2x2xf32>
    %312 = vector.extract_strided_slice %48 {offsets = [0, 8], sizes = [2, 2], strides = [1, 1]} : vector<2x10xf32> to vector<2x2xf32>
    %cst_91 = arith.constant dense<0xFF800000> : vector<2xf32>
    %313 = vector.multi_reduction <maximumf>, %311, %cst_91 [1] : vector<2x2xf32> to vector<2xf32>
    %314 = vector.shape_cast %313 : vector<2xf32> to vector<2x1xf32>
    %315 = vector.broadcast %314 : vector<2x1xf32> to vector<2x2xf32>
    %316 = arith.subf %311, %315 : vector<2x2xf32>
    %317 = math.exp %316 : vector<2x2xf32>
    %cst_92 = arith.constant dense<0.000000e+00> : vector<2xf32>
    %318 = vector.multi_reduction <add>, %317, %cst_92 [1] : vector<2x2xf32> to vector<2xf32>
    %319 = vector.shape_cast %318 : vector<2xf32> to vector<2x1xf32>
    %320 = math.log %319 : vector<2x1xf32>
    %321 = arith.addf %314, %320 : vector<2x1xf32>
    %322 = vector.broadcast %321 : vector<2x1xf32> to vector<2x2xf32>
    %323 = arith.subf %311, %322 : vector<2x2xf32>
    %324 = arith.mulf %312, %323 : vector<2x2xf32>
    %cst_93 = arith.constant dense<0.000000e+00> : vector<2xf32>
    %325 = vector.multi_reduction <add>, %324, %cst_93 [1] : vector<2x2xf32> to vector<2xf32>
    %326 = vector.shape_cast %325 : vector<2xf32> to vector<2x1xf32>
    %cst_94 = arith.constant 0.000000e+00 : f32
    %327 = vector.broadcast %cst_94 : f32 to vector<2x1xf32>
    %328 = arith.subf %327, %326 : vector<2x1xf32>
    %329 = vector.shape_cast %328 : vector<2x1xf32> to vector<1x2x1xf32>
    %cst_95 = arith.constant dense<0.000000e+00> : vector<1xf32>
    %330 = vector.multi_reduction <add>, %329, %cst_95 [1, 2] : vector<1x2x1xf32> to vector<1xf32>
    %331 = vector.shape_cast %330 : vector<1xf32> to vector<1x1x1xf32>
    %332 = vector.extract %331[0, 0, 0] : f32 from vector<1x1x1xf32>
    %333 = vector.broadcast %332 : f32 to vector<1x1xf32>
    %cst_96 = arith.constant 5.000000e-01 : f32
    %334 = vector.broadcast %cst_96 : f32 to vector<1x1xf32>
    %335 = arith.mulf %333, %334 : vector<1x1xf32>
    %336 = vector.shape_cast %335 : vector<1x1xf32> to vector<1x1xf32>
    %337 = vector.broadcast %336 : vector<1x1xf32> to vector<2x1xf32>
    %cst_97 = arith.constant 0.000000e+00 : f32
    %338 = vector.broadcast %cst_97 : f32 to vector<2x125xf32>
    %339 = tpu.concatenate %311, %337, %338 in 1 : vector<2x2xf32>, vector<2x1xf32>, vector<2x125xf32> -> vector<2x128xf32>
    %c0_98 = arith.constant 0 : index
    %c0_99 = arith.constant 0 : index
    %340 = vector.load %arg6[%c0_98, %c0_99] : memref<2x128xf32, #tpu.memory_space<vmem>>, vector<2x128xf32>
    tpu.vector_store %arg6[%c0_98, %c0_99], %339 {strides = array<i32>} : memref<2x128xf32, #tpu.memory_space<vmem>>, vector<2x128xf32>,
    return
  }
}

</mosaic_0001>

<bundles_post_ra>
// kernel: model_forward.1
= control target key start
LH: loop header
LB: loop body
LE: loop exit
PB: predicated region body
PF: predicated region fallthrough
CT: control target
= control target key end

     0   :  { %vm60_vm0 = vcmask 1043456   ;;  %v3213_v0 = vmov 0   ;;  %v3214_v10 = vmov 1   ;;  %v3215_v21 = vmov 0.0   ;;  %s3217_s21 = smov 96   ;;  %s3218_s22 = smov 64   ;;  %s3788_s0 = inlined_call_operand.vmem [shape: s32[16,2], index: 0, kind: input, shape index: {}]   ;;  %s3789_s2 = inlined_call_operand.vmem [shape: f32[216,32], index: 2, kind: input, shape index: {}]   ;;  %s3790_s3 = inlined_call_operand.vmem [shape: f32[2,3,32,128], index: 3, kind: input, shape index: {}]   ;;  %s3791_s5 = inlined_call_operand.vmem [shape: f32[2,8,128], index: 5, kind: input, shape index: {}]   ;;  %s3792_s1 = inlined_call_operand.vmem [shape: f32[2,10], index: 1, kind: input, shape index: {}]   ;;  %s3793_s4 = inlined_call_operand.vmem [shape: f32[2,64,32], index: 4, kind: input, shape index: {}]   ;;  %s3794_s6 = inlined_call_operand.vmem [shape: f32[2,128], index: 6, kind: output, shape index: {}]  }
   0x1   :  { %3143 = vset.pattern.permute.xlu0 %v3213_v0  ;;  %v23_v1 = vld [vmem:[%s3788_s0] sm:$0xff]  ;;  %v24_v4 = vld [vmem:[%s3788_s0 + $0x8] sm:$0xff]  ;;  %v50_v5 = vld [vmem:[%s3789_s2 + $0x58] sm:$0xff]  ;;  %3145 = vset.pattern.permute.xlu1 %v3214_v10  ;;  %v25_v22 = vlaneseq  ;;  %vm53_vm1 = vcmask 818176   ;;  %vm183_vm4 = vcmask 261120   ;;  %vm3216_vm5 = vmmov 0  }
   0x2   :  { %v51_v2 = vld [vmem:[%s3789_s2 + $0x60] sm:$0xf]  ;;  %28 = vperm.xlu0 %3143, %v23_v1   ;;  %v139_v3 = vcvt.s32.f32 %v23_v1  ;;  %v140_v6 = vcvt.s32.f32 %v24_v4  ;;  %v49_v7 = vld [vmem:[%s3789_s2 + $0x50] sm:$0xff]  ;;  %v48_v9 = vld [vmem:[%s3789_s2 + $0x48] sm:$0xff]  ;;  %s3219_s23 = smov 80   ;;  %vm368_vm6 = vcmask 130048  }
   0x3   :  { %2893 = vmatprep.subr.msk.mxu0 %vm60_vm0, %v51_v2  ;;  %v47_v11 = vld [vmem:[%s3789_s2 + $0x40] sm:$0xff]  ;;  %v46_v13 = vld [vmem:[%s3789_s2 + $0x38] sm:$0xff]  ;;  %v45_v14 = vld [vmem:[%s3789_s2 + $0x30] sm:$0xff]  ;;  %v26_v23 = vand.u32 127, %v25_v22  ;;  %vm524_vm7 = vcmask 64512   ;;  %s3221_s26 = smov 112  }
   0x4   :  { %2894 = vmatpush3.msk.msra.mxu0 %vm60_vm0, %v51_v2  ;;  %v143_v8 = vsub.f32 1.0, %v139_v3  ;;  %v144_v12 = vsub.f32 1.0, %v140_v6  ;;  %v44_v15 = vld [vmem:[%s3789_s2 + $0x28] sm:$0xff]  ;;  %v43_v16 = vld [vmem:[%s3789_s2 + $0x20] sm:$0xff]  ;;  %v42_v17 = vld [vmem:[%s3789_s2 + $0x18] sm:$0xff]  ;;  %s3222_s27 = smov 48  }
   0x5   :  { %2895 = vmatprep.subr.mxu0 %v50_v5  ;;  %v41_v18 = vld [vmem:[%s3789_s2 + $0x10] sm:$0xff]  ;;  %v40_v19 = vld [vmem:[%s3789_s2 + $0x8] sm:$0xff]  ;;  %v39_v20 = vld [vmem:[%s3789_s2] sm:$0xff]  ;;  %s3223_s11 = smov 16   ;;  %vm1251_vm8 = vcmask 523264   ;;  %vm2504_vm9 = vcmask 1041409  }
   0x6   :  { %2896 = vmatpush3.msra.mxu0 %v50_v5  ;;  %31 = vperm.xlu0 %3143, %v24_v4   ;;  %v2710_v30 = vld [vmem:[%s3789_s2 + $0x78] ss:$0 sm:$0xff]  ;;  %v52_v31 = vld [vmem:[%s3789_s2 + $0x68] sm:$0xff]  ;;  %v2711_v33 = vld [vmem:[%s3789_s2 + $0x79] ss:$0 sm:$0xff]  ;;  %vm2656_vm10 = vcmask 9216  }
   0x7   :  { %2897 = vmatprep.subr.mxu0 %v49_v7  ;;  %147 = vperm.xlu1 %3145, %v143_v8   ;;  %v252_v59 = vld [vmem:[%s3790_s3 + $0x18] sm:$0xff]  ;;  %v251_v60 = vld [vmem:[%s3790_s3 + $0x10] sm:$0xff]  ;;  %v250_v61 = vld [vmem:[%s3790_s3 + $0x8] sm:$0xff]  ;;  %s3225_s7 = smov 120   ;;  %vm2683_vm11 = vcmask 1024   ;;  %vm2696_vm12 = vcmask 15360  }
   0x8   :  { %2898 = vmatpush3.msra.mxu0 %v49_v7  ;;  %2922 = vmatprep.subr.mxu1 %v252_v59  ;;  %v249_v62 = vld [vmem:[%s3790_s3] sm:$0xff]  ;;  %vm2698_vm13 = vcmask 23552  }
   0x9   :  { %2899 = vmatprep.subr.mxu0 %v48_v9  ;;  %2923 = vmatpush3.msra.mxu1 %v252_v59 }
   0xa   :  { %2900 = vmatpush3.msra.mxu0 %v48_v9  ;;  %3144 = vset.pattern.permute.xlu0 %v3214_v10 }
   0xb   :  { %2901 = vmatprep.subr.mxu0 %v47_v11  ;;  %152 = vperm.xlu1 %3145, %v144_v12  }
   0xc   :  { %2902 = vmatpush3.msra.mxu0 %v47_v11  ;;  %165 = vperm.xlu0 %3144, %v139_v3   ;;  %v2713_v11 = vld [vmem:[%s3789_s2 + $0x81] ss:$0 sm:$0xff] }
   0xd   :  { %2903 = vmatprep.subr.mxu0 %v46_v13  ;;  %2924 = vmatprep.subr.mxu1 %v251_v60 }
   0xe   :  { %2904 = vmatpush3.msra.mxu0 %v46_v13  ;;  %2925 = vmatpush3.msra.mxu1 %v251_v60 }
   0xf   :  { %2905 = vmatprep.subr.mxu0 %v45_v14  ;;  %170 = vperm.xlu1 %3145, %v140_v6   ;;  %v2712_v6 = vld [vmem:[%s3789_s2 + $0x80] ss:$0 sm:$0xff] }
  0x10   :  { %2906 = vmatpush3.msra.mxu0 %v45_v14  ;;  %2926 = vmatprep.subr.mxu1 %v250_v61 }
  0x11   :  { %2907 = vmatprep.subr.mxu0 %v44_v15  ;;  %2927 = vmatpush3.msra.mxu1 %v250_v61 }
  0x12   :  { %2908 = vmatpush3.msra.mxu0 %v44_v15  ;;  %2928 = vmatprep.subr.mxu1 %v249_v62  ;;  %v3351_v15 = vshrl.u32 %v25_v22, 7 }
  0x13   :  { %2909 = vmatprep.subr.mxu0 %v43_v16  ;;  %2929 = vmatpush3.msra.mxu1 %v249_v62 }
  0x14   :  { %2910 = vmatpush3.msra.mxu0 %v43_v16  ;;  %2933 = vmatprep.subr.mxu1 %v3215_v21  ;;  %v3354_v16 = vsub.s32 0, %v3351_v15 }
  0x15   :  { %2911 = vmatprep.subr.mxu0 %v42_v17 }
  0x16   :  { %2912 = vmatpush3.msra.mxu0 %v42_v17  ;;  %v3359_v17 = vld [vmem:[%s3791_s5] sm:$0xff] }
  0x17   :  { %2913 = vmatprep.subr.mxu0 %v41_v18 }
  0x18   :  { %2914 = vmatpush3.msra.mxu0 %v41_v18  ;;  %v273_v18 = vrot.slane %v3359_v17, %v3354_v16 }
  0x19   :  { %2915 = vmatprep.subr.mxu0 %v40_v19 }
  0x1a   :  { %2916 = vmatpush3.msra.mxu0 %v40_v19 }
  0x1b   :  { %2917 = vmatprep.subr.mxu0 %v39_v20 }
  0x1c   :  { %2918 = vmatpush3.msra.mxu0 %v39_v20 }
  0x1d   :  { %2958 = vmatprep.subr.mxu0 %v3215_v21 }
  0x7d   :  { %v29_v24 = vpop.permute.xlu0 %28 }
  0x7e   :  { %vm33_vm2 = vcmp.eq.s32.totalorder %v26_v23, %v29_v24 }
  0x7f   :  { %v2705_v25 = vsel %vm33_vm2, 1.0, %v3215_v21 }
  0x80   :  { %2919 = vmatprep.mubr.msk.f32.mxu0 %vm53_vm1, %v2705_v25 }
  0x81   :  { %v32_v26 = vpop.permute.xlu0 %31 }
  0x82   :  { %vm34_vm3 = vcmp.eq.s32.totalorder %v26_v23, %v32_v26  ;;  %v148_v28 = vpop.permute.xlu1 %147 }
  0x83   :  { %v2706_v27 = vsel %vm34_vm3, 1.0, %v3215_v21  ;;  %v159_v38 = vmul.f32 %v2710_v30, %v148_v28 }
  0x84   :  { %2920 = vmatmul.mubr.msk.f32.vlgmr.msra.gmra.mxu0 %vm53_vm1, %v2706_v27  ;;  %v3220_v27 = vmov 1966171168  }
  0x85   :  { %2960 = vmatprep.mubr.msk.f32.mxu0 %vm3216_vm5, %v3215_v21  ;;  %v228_v28 = vunpack.c.l.s4 %v3220_v27 }
  0x86   :  { %v153_v29 = vpop.permute.xlu1 %152 }
  0x87   :  { %v166_v35 = vpop.permute.xlu0 %165  ;;  %v160_v36 = vmul.f32 %v2710_v30, %v153_v29  ;;  %v223_v29 = vld [vmem:[%s3792_s1] sm:$0x3] }
  0x88   :  { %v177_v43 = vmul.f32 %v2711_v33, %v166_v35  ;;  %v2714_v30 = vadd.f32 -1.0, %v223_v29 }
  0x8a   :  { %v171_v32 = vpop.permute.xlu1 %170 }
  0x8b   :  { %v178_v40 = vmul.f32 %v2711_v33, %v171_v32  ;;  %v225_v32 = vmul.f32 1e+09, %v2714_v30 }
 0x144   :  { %v2921_v34 = vpop.f32.mrf.mxu0 }
 0x145   :  { %v136_v37 = vadd.f32 %v2921_v34, %v52_v31 }
 0x146   :  { %v130_v39 = vpop.f32.mrf.mxu0 }
 0x147   :  { %v162_v41 = vadd.f32 %v160_v36, %v136_v37  ;;  %v131_v42 = vadd.f32 %v130_v39, %v52_v31  ;;  %v229_v31 = vunpack.c.0.s8 %v228_v28 }
 0x149   :  { %v161_v44 = vadd.f32 %v159_v38, %v131_v42  ;;  %v180_v45 = vadd.f32 %v178_v40, %v162_v41  ;;  %v232_v33 = vsub.s32 %v229_v31, %v3351_v15  ;;  %v254_v31 = vld [vmem:[%s3790_s3 + $0x28] sm:$0xff] }
 0x14b   :  { %v187_v46 = vsel %vm183_vm4, %v180_v45, 0.0  ;;  %v179_v47 = vadd.f32 %v177_v43, %v161_v44  ;;  %v233_v34 = vrot.slane %v225_v32, %v232_v33  ;;  %v253_v32 = vld [vmem:[%s3790_s3 + $0x20] sm:$0xff] }
 0x14c   :  { %188 = vadd.xlane.f32.xlu0 %v187_v46 }
 0x14d   :  { %v184_v48 = vsel %vm183_vm4, %v179_v47, 0.0  ;;  %v241_v35 = vrot.slane %v233_v34, %v232_v33  ;;  %v234_v36 = vcombine.high %v233_v34, %v233_v34 }
 0x14e   :  { %185 = vadd.xlane.f32.xlu1 %v184_v48 }
 0x14f   :  { %v3399_v37 = vrot.slane %v241_v35, %v3354_v16  ;;  %v248_v38 = vrot.slane %v234_v36, %v232_v33 }
 0x151   :  { %v3403_v41 = vrot.slane %v248_v38, %v3354_v16 }
 0x1d5   :  { %v189_v49 = vpop.xlane.xlu0 %188 }
 0x1d6   :  { %v192_v50 = vmul.f32 0.03125, %v189_v49 }
 0x1d7   :  { %v186_v51 = vpop.xlane.xlu1 %185 }
 0x1d8   :  { %v194_v52 = vsub.f32 %v180_v45, %v192_v50  ;;  %v191_v53 = vmul.f32 0.03125, %v186_v51 }
 0x1da   :  { %v193_v54 = vsub.f32 %v179_v47, %v191_v53  ;;  %v196_v55 = vmul.f32 %v194_v52, %v194_v52 }
 0x1dc   :  { %v200_v56 = vsel %vm183_vm4, %v196_v55, 0.0  ;;  %v195_v57 = vmul.f32 %v193_v54, %v193_v54 }
 0x1dd   :  { %201 = vadd.xlane.f32.xlu1 %v200_v56 }
 0x1de   :  { %v197_v58 = vsel %vm183_vm4, %v195_v57, 0.0 }
 0x1df   :  { %198 = vadd.xlane.f32.xlu0 %v197_v58 }
 0x266   :  { %v202_v63 = vpop.xlane.xlu1 %201 }
 0x267   :  { %v204_v0 = vmul.f32 0.03125, %v202_v63 }
 0x268   :  { %v199_v1 = vpop.xlane.xlu0 %198 }
 0x269   :  { %v206_v2 = vadd.f32 1e-12, %v204_v0  ;;  %v203_v3 = vmul.f32 0.03125, %v199_v1 }
 0x26b   :  { %3146 = vrsqrt.f32 %v206_v2  ;;  %v205_v4 = vadd.f32 1e-12, %v203_v3 }
 0x26d   :  { %3148 = vrsqrt.f32 %v205_v4 }
 0x278   :  { %v3147_v5 = vpop.eup %3146 }
 0x279   :  { %v210_v7 = vmul.f32 %v3147_v5, %v194_v52 }
 0x27a   :  { %v3149_v8 = vpop.eup %3148 }
 0x27b   :  { %v209_v9 = vmul.f32 %v3149_v8, %v193_v54  ;;  %v216_v10 = vmul.f32 %v2712_v6, %v210_v7 }
 0x27d   :  { %v215_v12 = vmul.f32 %v2712_v6, %v209_v9  ;;  %v3344_v14 = vadd.f32 %v2713_v11, %v216_v10 }
 0x27f   :  { %v3342_v13 = vadd.f32 %v2713_v11, %v215_v12 }
 0x281   :  { %2930 = vmatprep.mubr.msk.f32.mxu1 %vm183_vm4, %v3342_v13 }
 0x282   :  { %2931 = vmatmul.mubr.msk.f32.vlgmr.msra.gmra.mxu1 %vm183_vm4, %v3344_v14 }
 0x283   :  { %2935 = vmatprep.mubr.msk.f32.mxu1 %vm3216_vm5, %v3215_v21 }
 0x342   :  { %v2932_v19 = vpop.f32.mrf.mxu1 }
 0x343   :  { %v3367_v20 = vadd.f32 %v2932_v19, %v273_v18 }
 0x344   :  { %v346_v22 = vpop.f32.mrf.mxu1 }
 0x345   :  { %v3369_v23 = vadd.f32 %v346_v22, %v273_v18  ;;  %444 = vrot.lane.b32.xlu1 %v3367_v20, %s3217_s21 }
 0x347   :  { %366 = vrot.lane.b32.xlu0 %v3369_v23, %s3217_s21 }
 0x349   :  { %611 = vrot.lane.b32.xlu1 %v3367_v20, %s3218_s22 }
 0x34b   :  { %535 = vrot.lane.b32.xlu0 %v3369_v23, %s3218_s22 }
 0x34d   :  { %689 = vrot.lane.b32.xlu1 %v3369_v23, %s3219_s23 }
 0x3b7   :  { %v445_v25 = vpop.permute.xlu1 %444 }
 0x3b9   :  { %v367_v24 = vpop.permute.xlu0 %366 }
 0x3ba   :  { %2934 = vmatpush3.xpose.msk.msra.mxu1 %vm368_vm6, %v367_v24 }
 0x3bb   :  { %2938 = vmatprep.subr.mxu1 %v3215_v21  ;;  %v612_v52 = vpop.permute.xlu1 %611 }
 0x3bd   :  { %2936 = vmatmul.mubr.msk.f32.vlgmr.msra.gmra.mxu1 %vm368_vm6, %v3369_v23  ;;  %v536_v26 = vpop.permute.xlu0 %535 }
 0x3be   :  { %2939 = vmatpush3.xpose.msk.msra.mxu1 %vm368_vm6, %v445_v25  ;;  %2940 = vmatprep.mubr.msk.f32.mxu1 %vm3216_vm5, %v3215_v21 }
 0x3bf   :  { %2943 = vmatprep.subr.mxu1 %v3215_v21  ;;  %v690_v53 = vpop.permute.xlu1 %689 }
 0x3c1   :  { %2941 = vmatmul.mubr.msk.f32.vlgmr.msra.gmra.mxu1 %vm368_vm6, %v3367_v20 }
 0x3c2   :  { %2944 = vmatpush3.msra.mxu1 %v536_v26  ;;  %2945 = vmatprep.mubr.msk.f32.mxu1 %vm3216_vm5, %v3215_v21 }
 0x3c3   :  { %2948 = vmatprep.subr.mxu1 %v3215_v21 }
 0x47d   :  { %v439_v39 = vpop.f32.mrf.mxu1 }
 0x47e   :  { %v440_v40 = vadd.f32 %v439_v39, %v3399_v37 }
 0x47f   :  { %v2937_v42 = vpop.f32.mrf.mxu1 }
 0x480   :  { %v520_v43 = vmul.f32 1.442695, %v440_v40 }
 0x481   :  { %v516_v44 = vpop.f32.mrf.mxu1 }
 0x482   :  { %3150 = vpow2.f32 %v520_v43  ;;  %v517_v45 = vadd.f32 %v516_v44, %v3403_v41  ;;  %v1021_v43 = vsub.s32 1, %v3351_v15 }
 0x483   :  { %v2942_v46 = vpop.f32.mrf.mxu1 }
 0x484   :  { %v522_v47 = vmul.f32 1.442695, %v517_v45  ;;  %v1022_v44 = vrot.slane %v3359_v17, %v1021_v43 }
 0x486   :  { %3152 = vpow2.f32 %v522_v47 }
 0x48f   :  { %v3151_v48 = vpop.eup %3150 }
 0x490   :  { %v525_v49 = vsel %vm524_vm7, %v3151_v48, 0.0 }
 0x491   :  { %526 = vadd.xlane.f32.xlu1 %v525_v49 }
 0x493   :  { %v3153_v50 = vpop.eup %3152 }
 0x494   :  { %v528_v51 = vsel %vm524_vm7, %v3153_v50, 0.0 }
 0x495   :  { %529 = vadd.xlane.f32.xlu0 %v528_v51 }
 0x4a2   :  { %687 = vrot.lane.b32.xlu1 %v3369_v23, %s3221_s26 }
 0x4ab   :  { %767 = vrot.lane.b32.xlu0 %v3367_v20, %s3219_s23 }
 0x4af   :  { %765 = vrot.lane.b32.xlu0 %v3367_v20, %s3221_s26 }
 0x51a   :  { %v527_v54 = vpop.xlane.xlu1 %526 }
 0x51b   :  { %3154 = vrcp.f32 %v527_v54 }
 0x51e   :  { %v530_v55 = vpop.xlane.xlu0 %529  ;;  %v688_v62 = vpop.permute.xlu1 %687 }
 0x51f   :  { %3156 = vrcp.f32 %v530_v55 }
 0x522   :  { %v768_v56 = vpop.permute.xlu0 %767 }
 0x523   :  { %2959 = vmatpush3.xpose.msk.msra.mxu0 %vm368_vm6, %v768_v56 }
 0x524   :  { %2968 = vmatprep.subr.mxu0 %v3215_v21 }
 0x526   :  { %v766_v57 = vpop.permute.xlu0 %765 }
 0x527   :  { %2961 = vmatmul.mubr.msk.f32.vlgmr.msra.gmra.mxu0 %vm368_vm6, %v766_v57 }
 0x528   :  { %v3155_v58 = vpop.eup %3154  ;;  %2970 = vmatprep.mubr.msk.f32.mxu0 %vm3216_vm5, %v3215_v21 }
 0x529   :  { %v533_v59 = vmul.f32 %v3155_v58, %v3151_v48 }
 0x52b   :  { %2946 = vmatmul.mubr.msk.f32.vlgmr.msra.gmra.mxu1 %vm524_vm7, %v533_v59 }
 0x52c   :  { %v3157_v60 = vpop.eup %3156  ;;  %2949 = vmatpush3.msra.mxu1 %v612_v52  ;;  %2950 = vmatprep.mubr.msk.f32.mxu1 %vm3216_vm5, %v3215_v21 }
 0x52d   :  { %2953 = vmatprep.subr.mxu1 %v3215_v21  ;;  %v534_v61 = vmul.f32 %v3157_v60, %v3153_v50 }
 0x52f   :  { %2951 = vmatmul.mubr.msk.f32.vlgmr.msra.gmra.mxu1 %vm524_vm7, %v534_v61 }
 0x530   :  { %2954 = vmatpush3.xpose.msk.msra.mxu1 %vm368_vm6, %v690_v53  ;;  %2955 = vmatprep.mubr.msk.f32.mxu1 %vm3216_vm5, %v3215_v21 }
 0x531   :  { %2963 = vmatprep.subr.mxu1 %v3215_v21 }
 0x533   :  { %2956 = vmatmul.mubr.msk.f32.vlgmr.msra.gmra.mxu1 %vm368_vm6, %v688_v62  ;;  %v259_v62 = vld [vmem:[%s3790_s3 + $0x50] sm:$0xff] }
 0x534   :  { %2965 = vmatprep.mubr.msk.f32.mxu1 %vm3216_vm5, %v3215_v21 }
 0x5e7   :  { %v839_v63 = vpop.f32.mrf.mxu0 }
 0x5e8   :  { %v840_v0 = vadd.f32 %v839_v63, %v3403_v41  ;;  %v258_v63 = vld [vmem:[%s3790_s3 + $0x48] sm:$0xff] }
 0x5e9   :  { %v2962_v1 = vpop.f32.mrf.mxu0 }
 0x5ea   :  { %v845_v2 = vmul.f32 1.442695, %v840_v0  ;;  %v257_v0 = vld [vmem:[%s3790_s3 + $0x40] sm:$0xff] }
 0x5eb   :  { %v607_v3 = vpop.f32.mrf.mxu1 }
 0x5ec   :  { %3158 = vpow2.f32 %v845_v2 }
 0x5ed   :  { %v2947_v4 = vpop.f32.mrf.mxu1 }
 0x5ef   :  { %v683_v5 = vpop.f32.mrf.mxu1 }
 0x5f1   :  { %v2952_v6 = vpop.f32.mrf.mxu1 }
 0x5f3   :  { %v761_v7 = vpop.f32.mrf.mxu1 }
 0x5f4   :  { %v762_v8 = vadd.f32 %v761_v7, %v3399_v37  ;;  %v1134_v7 = vsub.s32 4, %v3351_v15 }
 0x5f5   :  { %v2957_v9 = vpop.f32.mrf.mxu1 }
 0x5f6   :  { %v843_v10 = vmul.f32 1.442695, %v762_v8  ;;  %v1135_v9 = vrot.slane %v3359_v17, %v1134_v7 }
 0x5f8   :  { %3160 = vpow2.f32 %v843_v10  ;;  %v1140_v10 = vsub.s32 5, %v3351_v15 }
 0x5f9   :  { %v3159_v11 = vpop.eup %3158 }
 0x5fa   :  { %v850_v12 = vsel %vm524_vm7, %v3159_v11, 0.0 }
 0x5fb   :  { %851 = vadd.xlane.f32.xlu0 %v850_v12 }
 0x605   :  { %v3161_v18 = vpop.eup %3160 }
 0x606   :  { %v847_v19 = vsel %vm524_vm7, %v3161_v18, 0.0 }
 0x607   :  { %848 = vadd.xlane.f32.xlu1 %v847_v19 }
 0x611   :  { %857 = vrot.lane.b32.xlu0 %v3369_v23, %s3222_s27  ;;  %v255_v23 = vld [vmem:[%s3790_s3 + $0x30] sm:$0xff] }
 0x618   :  { %933 = vrot.lane.b32.xlu1 %v3367_v20, %s3222_s27  ;;  %v256_v20 = vld [vmem:[%s3790_s3 + $0x38] sm:$0xff] }
 0x684   :  { %v852_v22 = vpop.xlane.xlu0 %851 }
 0x685   :  { %3162 = vrcp.f32 %v852_v22  ;;  %v1141_v22 = vrot.slane %v3359_v17, %v1140_v10 }
 0x688   :  { %v858_v24 = vpop.permute.xlu0 %857 }
 0x689   :  { %2964 = vmatpush3.msra.mxu1 %v858_v24 }
 0x68a   :  { %2973 = vmatprep.subr.mxu1 %v256_v20 }
 0x690   :  { %v849_v25 = vpop.xlane.xlu1 %848 }
 0x691   :  { %3164 = vrcp.f32 %v849_v25 }
 0x692   :  { %v3163_v26 = vpop.eup %3162 }
 0x693   :  { %v856_v27 = vmul.f32 %v3163_v26, %v3159_v11 }
 0x694   :  { %v934_v28 = vpop.permute.xlu1 %933 }
 0x695   :  { %2969 = vmatpush3.msra.mxu0 %v934_v28  ;;  %v268_v28 = vld [vmem:[%s3793_s4 + $0x30] sm:$0xff] }
 0x696   :  { %2971 = vmatmul.mubr.msk.f32.vlgmr.msra.gmra.mxu0 %vm524_vm7, %v856_v27  ;;  %v269_v27 = vld [vmem:[%s3793_s4 + $0x38] sm:$0xff] }
 0x69e   :  { %v3165_v29 = vpop.eup %3164 }
 0x69f   :  { %v855_v30 = vmul.f32 %v3165_v29, %v3161_v18  ;;  %v267_v29 = vld [vmem:[%s3793_s4 + $0x28] sm:$0xff] }
 0x6a1   :  { %2966 = vmatmul.mubr.msk.f32.vlgmr.msra.gmra.mxu1 %vm524_vm7, %v855_v30  ;;  %v266_v30 = vld [vmem:[%s3793_s4 + $0x20] sm:$0xff] }
 0x6a2   :  { %2974 = vmatpush3.msra.mxu1 %v256_v20  ;;  %v265_v20 = vld [vmem:[%s3793_s4 + $0x18] sm:$0xff] }
 0x6a3   :  { %2975 = vmatprep.subr.mxu1 %v255_v23 }
 0x6a4   :  { %2976 = vmatpush3.msra.mxu1 %v255_v23  ;;  %v264_v23 = vld [vmem:[%s3793_s4 + $0x10] sm:$0xff] }
 0x6a5   :  { %2977 = vmatprep.subr.mxu1 %v254_v31 }
 0x6a6   :  { %2978 = vmatpush3.msra.mxu1 %v254_v31  ;;  %v263_v31 = vld [vmem:[%s3793_s4 + $0x8] sm:$0xff] }
 0x6a7   :  { %2979 = vmatprep.subr.mxu1 %v253_v32 }
 0x6a8   :  { %2980 = vmatpush3.msra.mxu1 %v253_v32  ;;  %v262_v32 = vld [vmem:[%s3793_s4] sm:$0xff] }
 0x6a9   :  { %2995 = vmatprep.subr.mxu1 %v269_v27 }
 0x756   :  { %v1005_v33 = vpop.f32.mrf.mxu0 }
 0x757   :  { %1013 = vrot.lane.b32.xlu0 %v1005_v33, %s3223_s11  ;;  %v1146_v33 = vsub.s32 2, %v3351_v15 }
 0x758   :  { %v2972_v34 = vpop.f32.mrf.mxu0 }
 0x759   :  { %v1147_v34 = vrot.slane %v3359_v17, %v1146_v33 }
 0x761   :  { %v929_v35 = vpop.f32.mrf.mxu1 }
 0x762   :  { %1011 = vrot.lane.b32.xlu1 %v929_v35, %s3223_s11 }
 0x763   :  { %v2967_v36 = vpop.f32.mrf.mxu1 }
 0x7c9   :  { %v1014_v38 = vpop.permute.xlu0 %1013 }
 0x7ca   :  { %v1018_v42 = vsel %vm368_vm6, %v683_v5, %v1014_v38 }
 0x7d4   :  { %v1012_v39 = vpop.permute.xlu1 %1011 }
 0x7d5   :  { %v1017_v40 = vsel %vm368_vm6, %v607_v3, %v1012_v39 }
 0x7d6   :  { %2981 = vmatprep.mubr.msk.f32.mxu1 %vm183_vm4, %v1017_v40 }
 0x7d7   :  { %2982 = vmatmul.mubr.msk.f32.vlgmr.msra.gmra.mxu1 %vm183_vm4, %v1018_v42 }
 0x7d8   :  { %2996 = vmatpush3.msra.mxu1 %v269_v27  ;;  %v2735_v27 = vld [vmem:[%s3790_s3 + $0x60] sm:$0xff] }
 0x7d9   :  { %2997 = vmatprep.subr.mxu1 %v268_v28 }
 0x7da   :  { %2998 = vmatpush3.msra.mxu1 %v268_v28 }
 0x7db   :  { %2999 = vmatprep.subr.mxu1 %v267_v29 }
 0x7dc   :  { %3000 = vmatpush3.msra.mxu1 %v267_v29 }
 0x7dd   :  { %3001 = vmatprep.subr.mxu1 %v266_v30 }
 0x7de   :  { %3002 = vmatpush3.msra.mxu1 %v266_v30 }
 0x7df   :  { %3003 = vmatprep.subr.mxu1 %v265_v20 }
 0x7e0   :  { %3004 = vmatpush3.msra.mxu1 %v265_v20 }
 0x7e1   :  { %3005 = vmatprep.subr.mxu1 %v264_v23 }
 0x7e2   :  { %3006 = vmatpush3.msra.mxu1 %v264_v23 }
 0x7e3   :  { %3007 = vmatprep.subr.mxu1 %v263_v31 }
 0x7e4   :  { %3008 = vmatpush3.msra.mxu1 %v263_v31 }
 0x7e5   :  { %3009 = vmatprep.subr.mxu1 %v262_v32 }
 0x7e6   :  { %3010 = vmatpush3.msra.mxu1 %v262_v32  ;;  %v1363_v32 = vsub.s32 6, %v3351_v15 }
 0x7e7   :  { %3035 = vmatprep.subr.mxu1 %v3215_v21 }
 0x897   :  { %v2983_v45 = vpop.f32.mrf.mxu1 }
 0x898   :  { %v1101_v46 = vadd.f32 %v2983_v45, %v1022_v44 }
 0x899   :  { %v1095_v47 = vpop.f32.mrf.mxu1 }
 0x89a   :  { %v1096_v48 = vadd.f32 %v1095_v47, %v1022_v44  ;;  %v1105_v49 = vadd.f32 %v1101_v46, %v3344_v14 }
 0x89c   :  { %v1109_v50 = vsel %vm183_vm4, %v1105_v49, 0.0  ;;  %v1104_v51 = vadd.f32 %v1096_v48, %v3342_v13  ;;  %v260_v13 = vld [vmem:[%s3790_s3 + $0x58] sm:$0xff] }
 0x89d   :  { %1110 = vadd.xlane.f32.xlu0 %v1109_v50  ;;  %2984 = vmatprep.subr.mxu0 %v260_v13 }
 0x89e   :  { %v1106_v52 = vsel %vm183_vm4, %v1104_v51, 0.0  ;;  %2985 = vmatpush3.msra.mxu0 %v260_v13 }
 0x89f   :  { %1107 = vadd.xlane.f32.xlu1 %v1106_v52  ;;  %2986 = vmatprep.subr.mxu0 %v259_v62 }
 0x8a0   :  { %2987 = vmatpush3.msra.mxu0 %v259_v62 }
 0x8a1   :  { %2988 = vmatprep.subr.mxu0 %v258_v63 }
 0x8a2   :  { %2989 = vmatpush3.msra.mxu0 %v258_v63 }
 0x8a3   :  { %2990 = vmatprep.subr.mxu0 %v257_v0 }
 0x8a4   :  { %2991 = vmatpush3.msra.mxu0 %v257_v0 }
 0x926   :  { %v1111_v53 = vpop.xlane.xlu0 %1110 }
 0x927   :  { %v1113_v54 = vmul.f32 0.03125, %v1111_v53 }
 0x928   :  { %v1108_v55 = vpop.xlane.xlu1 %1107 }
 0x929   :  { %v1115_v56 = vsub.f32 %v1105_v49, %v1113_v54  ;;  %v1112_v57 = vmul.f32 0.03125, %v1108_v55 }
 0x92b   :  { %v1114_v58 = vsub.f32 %v1104_v51, %v1112_v57  ;;  %v1117_v59 = vmul.f32 %v1115_v56, %v1115_v56 }
 0x92d   :  { %v1121_v60 = vsel %vm183_vm4, %v1117_v59, 0.0  ;;  %v1116_v61 = vmul.f32 %v1114_v58, %v1114_v58 }
 0x92e   :  { %1122 = vadd.xlane.f32.xlu1 %v1121_v60  ;;  %v1249_v60 = vsub.s32 3, %v3351_v15 }
 0x92f   :  { %v1118_v14 = vsel %vm183_vm4, %v1116_v61, 0.0 }
 0x930   :  { %1119 = vadd.xlane.f32.xlu0 %v1118_v14  ;;  %v1250_v61 = vrot.slane %v3359_v17, %v1249_v60 }
 0x9b7   :  { %v1123_v1 = vpop.xlane.xlu1 %1122 }
 0x9b8   :  { %v1125_v2 = vmul.f32 0.03125, %v1123_v1 }
 0x9b9   :  { %v1120_v3 = vpop.xlane.xlu0 %1119 }
 0x9ba   :  { %v1127_v4 = vadd.f32 1e-12, %v1125_v2  ;;  %v1124_v5 = vmul.f32 0.03125, %v1120_v3 }
 0x9bc   :  { %3166 = vrsqrt.f32 %v1127_v4  ;;  %v1126_v6 = vadd.f32 1e-12, %v1124_v5 }
 0x9be   :  { %3168 = vrsqrt.f32 %v1126_v6 }
 0x9c9   :  { %v3167_v8 = vpop.eup %3166 }
 0x9ca   :  { %v1131_v11 = vmul.f32 %v3167_v8, %v1115_v56 }
 0x9cb   :  { %v3169_v12 = vpop.eup %3168 }
 0x9cc   :  { %v1130_v18 = vmul.f32 %v3169_v12, %v1114_v58  ;;  %v1137_v19 = vmul.f32 %v1135_v9, %v1131_v11 }
 0x9ce   :  { %v1136_v24 = vmul.f32 %v1135_v9, %v1130_v18  ;;  %v3491_v26 = vadd.f32 %v1141_v22, %v1137_v19 }
 0x9d0   :  { %v3489_v25 = vadd.f32 %v1141_v22, %v1136_v24  ;;  %v2738_v24 = vld [vmem:[%s3790_s3 + $0x78] sm:$0xff] }
 0x9d1   :  { %3014 = vmatprep.subr.mxu0 %v2738_v24 }
 0x9d2   :  { %2992 = vmatprep.mubr.msk.f32.mxu0 %vm183_vm4, %v3489_v25 }
 0x9d3   :  { %2993 = vmatmul.mubr.msk.f32.vlgmr.msra.gmra.mxu0 %vm183_vm4, %v3491_v26 }
 0x9d4   :  { %3015 = vmatpush3.msra.mxu0 %v2738_v24 }
 0xa93   :  { %v2994_v35 = vpop.f32.mrf.mxu0 }
 0xa94   :  { %v1226_v36 = vadd.f32 %v2994_v35, %v1147_v34  ;;  %v1364_v35 = vrot.slane %v3359_v17, %v1363_v32 }
 0xa95   :  { %v1220_v38 = vpop.f32.mrf.mxu0 }
 0xa96   :  { %v1232_v39 = vmul.f32 0.044715, %v1226_v36  ;;  %v1221_v40 = vadd.f32 %v1220_v38, %v1147_v34  ;;  %v1230_v57 = vmul.f32 0.5, %v1226_v36 }
 0xa98   :  { %v1234_v42 = vmul.f32 %v1232_v39, %v1226_v36  ;;  %v1231_v44 = vmul.f32 0.044715, %v1221_v40  ;;  %v1229_v55 = vmul.f32 0.5, %v1221_v40 }
 0xa9a   :  { %v1236_v45 = vmul.f32 %v1234_v42, %v1226_v36  ;;  %v1233_v46 = vmul.f32 %v1231_v44, %v1221_v40 }
 0xa9c   :  { %v1238_v47 = vadd.f32 %v1236_v45, %v1226_v36  ;;  %v1235_v48 = vmul.f32 %v1233_v46, %v1221_v40  ;;  %v1369_v36 = vsub.s32 7, %v3351_v15  ;;  %v2495_v15 = vld [vmem:[%s3789_s2 + $0xc8] sm:$0xff] }
 0xa9e   :  { %v1240_v49 = vmul.f32 0.7978846, %v1238_v47  ;;  %v1237_v50 = vadd.f32 %v1235_v48, %v1221_v40  ;;  %v1370_v44 = vrot.slane %v3359_v17, %v1369_v36  ;;  %v3574_v48 = vld [vmem:[%s3791_s5 + $0x8] sm:$0xff] }
 0xa9f   :  { %v1400_v17 = vrot.slane %v3574_v48, %v3354_v16 }
 0xaa0   :  { %3170 = vtanh.f32 %v1240_v49  ;;  %v1239_v51 = vmul.f32 0.7978846, %v1237_v50 }
 0xaa2   :  { %3172 = vtanh.f32 %v1239_v51 }
 0xaad   :  { %v3171_v52 = vpop.eup %3170 }
 0xaae   :  { %v1244_v54 = vadd.f32 1.0, %v3171_v52 }
 0xaaf   :  { %v3173_v53 = vpop.eup %3172 }
 0xab0   :  { %v1243_v56 = vadd.f32 1.0, %v3173_v53  ;;  %v1246_v59 = vmul.f32 %v1244_v54, %v1230_v57 }
 0xab2   :  { %v1245_v58 = vmul.f32 %v1243_v56, %v1229_v55 }
 0xab4   :  { %3011 = vmatprep.mubr.msk.f32.mxu1 %vm1251_vm8, %v1245_v58 }
 0xab5   :  { %3012 = vmatmul.mubr.msk.f32.vlgmr.msra.gmra.mxu1 %vm1251_vm8, %v1246_v59 }
 0xab6   :  { %3037 = vmatprep.mubr.msk.f32.mxu1 %vm3216_vm5, %v3215_v21 }
 0xb75   :  { %v3013_v14 = vpop.f32.mrf.mxu1 }
 0xb76   :  { %v1330_v13 = vadd.f32 %v3013_v14, %v1250_v61 }
 0xb77   :  { %v1324_v62 = vpop.f32.mrf.mxu1 }
 0xb78   :  { %v1325_v63 = vadd.f32 %v1324_v62, %v1250_v61  ;;  %v1334_v0 = vadd.f32 %v1330_v13, %v3491_v26  ;;  %v2736_v26 = vld [vmem:[%s3790_s3 + $0x68] sm:$0xff] }
 0xb7a   :  { %v1338_v1 = vsel %vm183_vm4, %v1334_v0, 0.0  ;;  %v1333_v2 = vadd.f32 %v1325_v63, %v3489_v25  ;;  %v2737_v25 = vld [vmem:[%s3790_s3 + $0x70] sm:$0xff] }
 0xb7b   :  { %1339 = vadd.xlane.f32.xlu1 %v1338_v1  ;;  %3016 = vmatprep.subr.mxu0 %v2737_v25 }
 0xb7c   :  { %v1335_v3 = vsel %vm183_vm4, %v1333_v2, 0.0  ;;  %3017 = vmatpush3.msra.mxu0 %v2737_v25 }
 0xb7d   :  { %1336 = vadd.xlane.f32.xlu0 %v1335_v3  ;;  %3018 = vmatprep.subr.mxu0 %v2736_v26 }
 0xb7e   :  { %3019 = vmatpush3.msra.mxu0 %v2736_v26 }
 0xb7f   :  { %3020 = vmatprep.subr.mxu0 %v2735_v27 }
 0xb80   :  { %3021 = vmatpush3.msra.mxu0 %v2735_v27 }
 0xb81   :  { %3025 = vmatprep.subr.mxu0 %v3215_v21 }
 0xc04   :  { %v1340_v4 = vpop.xlane.xlu1 %1339 }
 0xc05   :  { %v1342_v5 = vmul.f32 0.03125, %v1340_v4 }
 0xc06   :  { %v1337_v6 = vpop.xlane.xlu0 %1336 }
 0xc07   :  { %v1344_v8 = vsub.f32 %v1334_v0, %v1342_v5  ;;  %v1341_v9 = vmul.f32 0.03125, %v1337_v6 }
 0xc09   :  { %v1343_v11 = vsub.f32 %v1333_v2, %v1341_v9  ;;  %v1346_v12 = vmul.f32 %v1344_v8, %v1344_v8 }
 0xc0b   :  { %v1350_v18 = vsel %vm183_vm4, %v1346_v12, 0.0  ;;  %v1345_v19 = vmul.f32 %v1343_v11, %v1343_v11 }
 0xc0c   :  { %1351 = vadd.xlane.f32.xlu1 %v1350_v18 }
 0xc0d   :  { %v1347_v22 = vsel %vm183_vm4, %v1345_v19, 0.0 }
 0xc0e   :  { %1348 = vadd.xlane.f32.xlu0 %v1347_v22 }
 0xc95   :  { %v1352_v28 = vpop.xlane.xlu1 %1351 }
 0xc96   :  { %v1354_v29 = vmul.f32 0.03125, %v1352_v28 }
 0xc97   :  { %v1349_v30 = vpop.xlane.xlu0 %1348 }
 0xc98   :  { %v1356_v20 = vadd.f32 1e-12, %v1354_v29  ;;  %v1353_v23 = vmul.f32 0.03125, %v1349_v30 }
 0xc9a   :  { %3174 = vrsqrt.f32 %v1356_v20  ;;  %v1355_v31 = vadd.f32 1e-12, %v1353_v23 }
 0xc9c   :  { %3176 = vrsqrt.f32 %v1355_v31 }
 0xca7   :  { %v3175_v34 = vpop.eup %3174 }
 0xca8   :  { %v1360_v38 = vmul.f32 %v3175_v34, %v1344_v8 }
 0xca9   :  { %v3177_v39 = vpop.eup %3176 }
 0xcaa   :  { %v1359_v40 = vmul.f32 %v3177_v39, %v1343_v11  ;;  %v1366_v42 = vmul.f32 %v1364_v35, %v1360_v38 }
 0xcac   :  { %v1365_v45 = vmul.f32 %v1364_v35, %v1359_v40  ;;  %v3563_v47 = vadd.f32 %v1370_v44, %v1366_v42 }
 0xcae   :  { %v3561_v46 = vadd.f32 %v1370_v44, %v1365_v45 }
 0xcb0   :  { %3022 = vmatprep.mubr.msk.f32.mxu0 %vm183_vm4, %v3561_v46 }
 0xcb1   :  { %3023 = vmatmul.mubr.msk.f32.vlgmr.msra.gmra.mxu0 %vm183_vm4, %v3563_v47 }
 0xcb2   :  { %3027 = vmatprep.mubr.msk.f32.mxu0 %vm3216_vm5, %v3215_v21 }
 0xd71   :  { %v3024_v49 = vpop.f32.mrf.mxu0 }
 0xd72   :  { %v3578_v50 = vadd.f32 %v3024_v49, %v1400_v17 }
 0xd73   :  { %v1473_v51 = vpop.f32.mrf.mxu0 }
 0xd74   :  { %v3580_v52 = vadd.f32 %v1473_v51, %v1400_v17  ;;  %1560 = vrot.lane.b32.xlu1 %v3578_v50, %s3217_s21 }
 0xd76   :  { %1483 = vrot.lane.b32.xlu0 %v3580_v52, %s3217_s21 }
 0xd78   :  { %1726 = vrot.lane.b32.xlu1 %v3578_v50, %s3218_s22 }
 0xd7a   :  { %1650 = vrot.lane.b32.xlu0 %v3580_v52, %s3218_s22 }
 0xd7c   :  { %1804 = vrot.lane.b32.xlu1 %v3580_v52, %s3219_s23 }
 0xde6   :  { %v1561_v53 = vpop.permute.xlu1 %1560 }
 0xde8   :  { %v1484_v16 = vpop.permute.xlu0 %1483 }
 0xde9   :  { %3026 = vmatpush3.xpose.msk.msra.mxu0 %vm368_vm6, %v1484_v16  ;;  %v2740_v16 = vld [vmem:[%s3790_s3 + $0x88] sm:$0xff] }
 0xdea   :  { %3030 = vmatprep.subr.mxu0 %v3215_v21  ;;  %v1727_v55 = vpop.permute.xlu1 %1726 }
 0xdec   :  { %3028 = vmatmul.mubr.msk.f32.vlgmr.msra.gmra.mxu0 %vm368_vm6, %v3580_v52  ;;  %v1651_v54 = vpop.permute.xlu0 %1650 }
 0xded   :  { %3031 = vmatpush3.xpose.msk.msra.mxu0 %vm368_vm6, %v1561_v53  ;;  %3036 = vmatpush3.msra.mxu1 %v1651_v54  ;;  %v2739_v53 = vld [vmem:[%s3790_s3 + $0x80] sm:$0xff] }
 0xdee   :  { %3032 = vmatprep.mubr.msk.f32.mxu0 %vm3216_vm5, %v3215_v21  ;;  %3040 = vmatprep.subr.mxu0 %v3215_v21  ;;  %v1805_v3 = vpop.permute.xlu1 %1804 }
 0xdef   :  { %3045 = vmatprep.subr.mxu1 %v3215_v21 }
 0xdf0   :  { %3033 = vmatmul.mubr.msk.f32.vlgmr.msra.gmra.mxu0 %vm368_vm6, %v3578_v50 }
 0xdf1   :  { %3041 = vmatpush3.msra.mxu0 %v1727_v55  ;;  %3042 = vmatprep.mubr.msk.f32.mxu0 %vm3216_vm5, %v3215_v21 }
 0xdf2   :  { %3050 = vmatprep.subr.mxu0 %v3215_v21 }
 0xeac   :  { %v1555_v56 = vpop.f32.mrf.mxu0 }
 0xead   :  { %v1556_v57 = vadd.f32 %v1555_v56, %v3399_v37 }
 0xeae   :  { %v3029_v58 = vpop.f32.mrf.mxu0 }
 0xeaf   :  { %v1636_v59 = vmul.f32 1.442695, %v1556_v57 }
 0xeb0   :  { %v1632_v61 = vpop.f32.mrf.mxu0 }
 0xeb1   :  { %3178 = vpow2.f32 %v1636_v59  ;;  %v1633_v14 = vadd.f32 %v1632_v61, %v3403_v41 }
 0xeb2   :  { %v3034_v13 = vpop.f32.mrf.mxu0 }
 0xeb3   :  { %v1638_v62 = vmul.f32 1.442695, %v1633_v14  ;;  %v2137_v13 = vrot.slane %v3574_v48, %v1021_v43 }
 0xeb5   :  { %3180 = vpow2.f32 %v1638_v62 }
 0xebe   :  { %v3179_v63 = vpop.eup %3178 }
 0xebf   :  { %v1640_v0 = vsel %vm524_vm7, %v3179_v63, 0.0 }
 0xec0   :  { %1641 = vadd.xlane.f32.xlu1 %v1640_v0 }
 0xec2   :  { %v3181_v1 = vpop.eup %3180 }
 0xec3   :  { %v1643_v2 = vsel %vm524_vm7, %v3181_v1, 0.0 }
 0xec4   :  { %1644 = vadd.xlane.f32.xlu0 %v1643_v2 }
 0xed1   :  { %1802 = vrot.lane.b32.xlu1 %v3580_v52, %s3221_s26 }
 0xeda   :  { %1882 = vrot.lane.b32.xlu0 %v3578_v50, %s3219_s23 }
 0xede   :  { %1880 = vrot.lane.b32.xlu0 %v3578_v50, %s3221_s26 }
 0xf49   :  { %v1642_v4 = vpop.xlane.xlu1 %1641 }
 0xf4a   :  { %3182 = vrcp.f32 %v1642_v4 }
 0xf4d   :  { %v1645_v5 = vpop.xlane.xlu0 %1644  ;;  %v1803_v18 = vpop.permute.xlu1 %1802 }
 0xf4e   :  { %3184 = vrcp.f32 %v1645_v5 }
 0xf51   :  { %v1883_v11 = vpop.permute.xlu0 %1882 }
 0xf55   :  { %v1881_v19 = vpop.permute.xlu0 %1880 }
 0xf57   :  { %v3183_v6 = vpop.eup %3182 }
 0xf58   :  { %v1648_v8 = vmul.f32 %v3183_v6, %v3179_v63 }
 0xf5a   :  { %3038 = vmatmul.mubr.msk.f32.vlgmr.msra.gmra.mxu1 %vm524_vm7, %v1648_v8 }
 0xf5b   :  { %v3185_v9 = vpop.eup %3184  ;;  %3046 = vmatpush3.xpose.msk.msra.mxu1 %vm368_vm6, %v1805_v3  ;;  %3047 = vmatprep.mubr.msk.f32.mxu1 %vm3216_vm5, %v3215_v21 }
 0xf5c   :  { %v1649_v12 = vmul.f32 %v3185_v9, %v3181_v1  ;;  %3055 = vmatprep.subr.mxu1 %v3215_v21 }
 0xf5e   :  { %3043 = vmatmul.mubr.msk.f32.vlgmr.msra.gmra.mxu0 %vm524_vm7, %v1649_v12  ;;  %3048 = vmatmul.mubr.msk.f32.vlgmr.msra.gmra.mxu1 %vm368_vm6, %v1803_v18 }
 0xf5f   :  { %3051 = vmatpush3.xpose.msk.msra.mxu0 %vm368_vm6, %v1883_v11  ;;  %3052 = vmatprep.mubr.msk.f32.mxu0 %vm3216_vm5, %v3215_v21 }
 0xf60   :  { %3060 = vmatprep.subr.mxu0 %v3215_v21  ;;  %3057 = vmatprep.mubr.msk.f32.mxu1 %vm3216_vm5, %v3215_v21 }
 0xf62   :  { %3053 = vmatmul.mubr.msk.f32.vlgmr.msra.gmra.mxu0 %vm368_vm6, %v1881_v19 }
 0xf63   :  { %3062 = vmatprep.mubr.msk.f32.mxu0 %vm3216_vm5, %v3215_v21 }
0x101a   :  { %v1722_v22 = vpop.f32.mrf.mxu1 }
0x101c   :  { %v3039_v24 = vpop.f32.mrf.mxu1 }
0x101d   :  { %v2745_v24 = vld [vmem:[%s3790_s3 + $0xb0] sm:$0xff] }
0x101e   :  { %v1798_v25 = vpop.f32.mrf.mxu0  ;;  %v1876_v26 = vpop.f32.mrf.mxu1 }
0x101f   :  { %v1877_v27 = vadd.f32 %v1876_v26, %v3399_v37  ;;  %v2743_v26 = vld [vmem:[%s3790_s3 + $0xa0] sm:$0xff] }
0x1020   :  { %v3044_v28 = vpop.f32.mrf.mxu0  ;;  %v3049_v29 = vpop.f32.mrf.mxu1 }
0x1021   :  { %v1958_v30 = vmul.f32 1.442695, %v1877_v27 }
0x1022   :  { %v1954_v20 = vpop.f32.mrf.mxu0 }
0x1023   :  { %3186 = vpow2.f32 %v1958_v30  ;;  %v1955_v23 = vadd.f32 %v1954_v20, %v3403_v41 }
0x1024   :  { %v3054_v31 = vpop.f32.mrf.mxu0 }
0x1025   :  { %v1960_v34 = vmul.f32 1.442695, %v1955_v23 }
0x1027   :  { %3188 = vpow2.f32 %v1960_v34  ;;  %v2250_v34 = vrot.slane %v3574_v48, %v1134_v7  ;;  %v2755_v7 = vld [vmem:[%s3793_s4 + $0x78] sm:$0xff] }
0x1030   :  { %v3187_v35 = vpop.eup %3186 }
0x1031   :  { %v1962_v38 = vsel %vm524_vm7, %v3187_v35, 0.0 }
0x1032   :  { %1963 = vadd.xlane.f32.xlu1 %v1962_v38 }
0x1034   :  { %v3189_v39 = vpop.eup %3188 }
0x1035   :  { %v1965_v40 = vsel %vm524_vm7, %v3189_v39, 0.0 }
0x1036   :  { %1966 = vadd.xlane.f32.xlu0 %v1965_v40 }
0x1043   :  { %2048 = vrot.lane.b32.xlu1 %v3578_v50, %s3222_s27  ;;  %v2742_v50 = vld [vmem:[%s3790_s3 + $0x98] sm:$0xff] }
0x104c   :  { %1972 = vrot.lane.b32.xlu0 %v3580_v52, %s3222_s27  ;;  %v2741_v52 = vld [vmem:[%s3790_s3 + $0x90] sm:$0xff] }
0x10bb   :  { %v1964_v37 = vpop.xlane.xlu1 %1963 }
0x10bc   :  { %3190 = vrcp.f32 %v1964_v37  ;;  %v2256_v37 = vrot.slane %v3574_v48, %v1140_v10  ;;  %v2754_v10 = vld [vmem:[%s3793_s4 + $0x70] sm:$0xff] }
0x10bf   :  { %v2049_v41 = vpop.permute.xlu1 %2048  ;;  %v1967_v42 = vpop.xlane.xlu0 %1966 }
0x10c0   :  { %3192 = vrcp.f32 %v1967_v42  ;;  %3061 = vmatpush3.msra.mxu0 %v2049_v41 }
0x10c3   :  { %v1973_v44 = vpop.permute.xlu0 %1972 }
0x10c4   :  { %3056 = vmatpush3.msra.mxu1 %v1973_v44 }
0x10c5   :  { %3065 = vmatprep.subr.mxu1 %v2742_v50 }
0x10c9   :  { %v3191_v45 = vpop.eup %3190 }
0x10ca   :  { %v1970_v17 = vmul.f32 %v3191_v45, %v3187_v35  ;;  %v2753_v45 = vld [vmem:[%s3793_s4 + $0x68] sm:$0xff] }
0x10cc   :  { %3058 = vmatmul.mubr.msk.f32.vlgmr.msra.gmra.mxu1 %vm524_vm7, %v1970_v17  ;;  %v2752_v17 = vld [vmem:[%s3793_s4 + $0x60] sm:$0xff] }
0x10cd   :  { %v3193_v49 = vpop.eup %3192  ;;  %3066 = vmatpush3.msra.mxu1 %v2742_v50  ;;  %v2749_v50 = vld [vmem:[%s3793_s4 + $0x48] sm:$0xff] }
0x10ce   :  { %v1971_v51 = vmul.f32 %v3193_v49, %v3189_v39  ;;  %3067 = vmatprep.subr.mxu1 %v2741_v52  ;;  %v2751_v49 = vld [vmem:[%s3793_s4 + $0x58] sm:$0xff] }
0x10cf   :  { %3068 = vmatpush3.msra.mxu1 %v2741_v52  ;;  %v2748_v52 = vld [vmem:[%s3793_s4 + $0x40] sm:$0xff] }
0x10d0   :  { %3063 = vmatmul.mubr.msk.f32.vlgmr.msra.gmra.mxu0 %vm524_vm7, %v1971_v51  ;;  %3069 = vmatprep.subr.mxu1 %v2740_v16  ;;  %v2750_v51 = vld [vmem:[%s3793_s4 + $0x50] sm:$0xff] }
0x10d1   :  { %3070 = vmatpush3.msra.mxu1 %v2740_v16  ;;  %v2262_v16 = vrot.slane %v3574_v48, %v1146_v33 }
0x10d2   :  { %3071 = vmatprep.subr.mxu1 %v2739_v53 }
0x10d3   :  { %3072 = vmatpush3.msra.mxu1 %v2739_v53 }
0x10d4   :  { %3087 = vmatprep.subr.mxu1 %v2755_v7 }
0x118c   :  { %v2044_v54 = vpop.f32.mrf.mxu1 }
0x118d   :  { %2126 = vrot.lane.b32.xlu1 %v2044_v54, %s3223_s11 }
0x118e   :  { %v3059_v55 = vpop.f32.mrf.mxu1 }
0x1190   :  { %v2120_v56 = vpop.f32.mrf.mxu0 }
0x1191   :  { %2128 = vrot.lane.b32.xlu0 %v2120_v56, %s3223_s11 }
0x1192   :  { %v3064_v57 = vpop.f32.mrf.mxu0 }
0x11ff   :  { %v2127_v58 = vpop.permute.xlu1 %2126 }
0x1200   :  { %v2132_v59 = vsel %vm368_vm6, %v1722_v22, %v2127_v58 }
0x1201   :  { %3073 = vmatprep.mubr.msk.f32.mxu1 %vm183_vm4, %v2132_v59 }
0x1203   :  { %v2129_v61 = vpop.permute.xlu0 %2128 }
0x1204   :  { %v2133_v14 = vsel %vm368_vm6, %v1798_v25, %v2129_v61  ;;  %v2744_v25 = vld [vmem:[%s3790_s3 + $0xa8] sm:$0xff] }
0x1205   :  { %3074 = vmatmul.mubr.msk.f32.vlgmr.msra.gmra.mxu1 %vm183_vm4, %v2133_v14 }
0x1206   :  { %3088 = vmatpush3.msra.mxu1 %v2755_v7 }
0x1207   :  { %3089 = vmatprep.subr.mxu1 %v2754_v10 }
0x1208   :  { %3090 = vmatpush3.msra.mxu1 %v2754_v10  ;;  %v2478_v10 = vrot.slane %v3574_v48, %v1363_v32  ;;  %v2494_v32 = vld [vmem:[%s3789_s2 + $0xc0] sm:$0xff] }
0x1209   :  { %3091 = vmatprep.subr.mxu1 %v2753_v45 }
0x120a   :  { %3092 = vmatpush3.msra.mxu1 %v2753_v45 }
0x120b   :  { %3093 = vmatprep.subr.mxu1 %v2752_v17 }
0x120c   :  { %3094 = vmatpush3.msra.mxu1 %v2752_v17 }
0x120d   :  { %3095 = vmatprep.subr.mxu1 %v2751_v49 }
0x120e   :  { %3096 = vmatpush3.msra.mxu1 %v2751_v49  ;;  %v2484_v49 = vrot.slane %v3574_v48, %v1369_v36  ;;  %v2493_v36 = vld [vmem:[%s3789_s2 + $0xb8] sm:$0xff] }
0x120f   :  { %3097 = vmatprep.subr.mxu1 %v2750_v51 }
0x1210   :  { %3098 = vmatpush3.msra.mxu1 %v2750_v51 }
0x1211   :  { %3099 = vmatprep.subr.mxu1 %v2749_v50 }
0x1212   :  { %3100 = vmatpush3.msra.mxu1 %v2749_v50 }
0x1213   :  { %3101 = vmatprep.subr.mxu1 %v2748_v52 }
0x1214   :  { %3102 = vmatpush3.msra.mxu1 %v2748_v52 }
0x12c5   :  { %v3075_v62 = vpop.f32.mrf.mxu1 }
0x12c6   :  { %v2216_v63 = vadd.f32 %v3075_v62, %v2137_v13 }
0x12c7   :  { %v2210_v0 = vpop.f32.mrf.mxu1 }
0x12c8   :  { %v2211_v1 = vadd.f32 %v2210_v0, %v2137_v13  ;;  %v2220_v2 = vadd.f32 %v2216_v63, %v3563_v47 }
0x12ca   :  { %v2224_v3 = vsel %vm183_vm4, %v2220_v2, 0.0  ;;  %v2219_v4 = vadd.f32 %v2211_v1, %v3561_v46  ;;  %v2746_v46 = vld [vmem:[%s3790_s3 + $0xb8] sm:$0xff] }
0x12cb   :  { %2225 = vadd.xlane.f32.xlu0 %v2224_v3  ;;  %3076 = vmatprep.subr.mxu0 %v2746_v46 }
0x12cc   :  { %v2221_v5 = vsel %vm183_vm4, %v2219_v4, 0.0  ;;  %3077 = vmatpush3.msra.mxu0 %v2746_v46 }
0x12cd   :  { %2222 = vadd.xlane.f32.xlu1 %v2221_v5  ;;  %3078 = vmatprep.subr.mxu0 %v2745_v24 }
0x12ce   :  { %3079 = vmatpush3.msra.mxu0 %v2745_v24 }
0x12cf   :  { %3080 = vmatprep.subr.mxu0 %v2744_v25 }
0x12d0   :  { %3081 = vmatpush3.msra.mxu0 %v2744_v25 }
0x12d1   :  { %3082 = vmatprep.subr.mxu0 %v2743_v26 }
0x12d2   :  { %3083 = vmatpush3.msra.mxu0 %v2743_v26 }
0x12d3   :  { %3106 = vmatprep.subr.mxu0 %v3215_v21 }
0x1354   :  { %v2226_v6 = vpop.xlane.xlu0 %2225 }
0x1355   :  { %v2228_v8 = vmul.f32 0.03125, %v2226_v6 }
0x1356   :  { %v2223_v9 = vpop.xlane.xlu1 %2222 }
0x1357   :  { %v2230_v11 = vsub.f32 %v2220_v2, %v2228_v8  ;;  %v2227_v12 = vmul.f32 0.03125, %v2223_v9 }
0x1359   :  { %v2229_v43 = vsub.f32 %v2219_v4, %v2227_v12  ;;  %v2232_v18 = vmul.f32 %v2230_v11, %v2230_v11 }
0x135b   :  { %v2236_v19 = vsel %vm183_vm4, %v2232_v18, 0.0  ;;  %v2231_v22 = vmul.f32 %v2229_v43, %v2229_v43 }
0x135c   :  { %2237 = vadd.xlane.f32.xlu1 %v2236_v19 }
0x135d   :  { %v2233_v47 = vsel %vm183_vm4, %v2231_v22, 0.0 }
0x135e   :  { %2234 = vadd.xlane.f32.xlu0 %v2233_v47 }
0x13e5   :  { %v2238_v27 = vpop.xlane.xlu1 %2237 }
0x13e6   :  { %v2240_v28 = vmul.f32 0.03125, %v2238_v27 }
0x13e7   :  { %v2235_v29 = vpop.xlane.xlu0 %2234 }
0x13e8   :  { %v2242_v30 = vadd.f32 1e-12, %v2240_v28  ;;  %v2239_v20 = vmul.f32 0.03125, %v2235_v29 }
0x13ea   :  { %3194 = vrsqrt.f32 %v2242_v30  ;;  %v2241_v23 = vadd.f32 1e-12, %v2239_v20 }
0x13ec   :  { %3196 = vrsqrt.f32 %v2241_v23 }
0x13f7   :  { %v3195_v31 = vpop.eup %3194 }
0x13f8   :  { %v2246_v35 = vmul.f32 %v3195_v31, %v2230_v11  ;;  %v2365_v11 = vrot.slane %v3574_v48, %v1249_v60  ;;  %v2492_v48 = vld [vmem:[%s3789_s2 + $0xb0] sm:$0xff] }
0x13f9   :  { %v3197_v38 = vpop.eup %3196 }
0x13fa   :  { %v2245_v39 = vmul.f32 %v3197_v38, %v2229_v43  ;;  %v2252_v40 = vmul.f32 %v2250_v34, %v2246_v35  ;;  %v2489_v35 = vld [vmem:[%s3789_s2 + $0x98] sm:$0xff]  ;;  %v2488_v38 = vld [vmem:[%s3789_s2 + $0x90] sm:$0xff] }
0x13fc   :  { %v2251_v41 = vmul.f32 %v2250_v34, %v2245_v39  ;;  %v2258_v44 = vadd.f32 %v2256_v37, %v2252_v40  ;;  %v2490_v34 = vld [vmem:[%s3789_s2 + $0xa0] sm:$0xff]  ;;  %v2487_v39 = vld [vmem:[%s3789_s2 + $0x88] sm:$0xff] }
0x13fe   :  { %v3688_v42 = vadd.f32 %v2256_v37, %v2251_v41 }
0x1400   :  { %3084 = vmatprep.mubr.msk.f32.mxu0 %vm183_vm4, %v3688_v42 }
0x1401   :  { %3085 = vmatmul.mubr.msk.f32.vlgmr.msra.gmra.mxu0 %vm183_vm4, %v2258_v44 }
0x1402   :  { %3114 = vmatprep.mubr.msk.f32.mxu0 %vm3216_vm5, %v3215_v21  ;;  %3107 = vmatpush3.msra.mxu0 %v2490_v34 }
0x1403   :  { %3108 = vmatprep.subr.mxu0 %v3215_v21 }
0x1404   :  { %3109 = vmatpush3.msra.mxu0 %v2489_v35 }
0x1405   :  { %3110 = vmatprep.subr.mxu0 %v3215_v21 }
0x1406   :  { %3111 = vmatpush3.msra.mxu0 %v2488_v38 }
0x1407   :  { %3112 = vmatprep.subr.mxu0 %v3215_v21 }
0x1408   :  { %3113 = vmatpush3.msra.mxu0 %v2487_v39 }
0x1409   :  { %3117 = vmatprep.subr.mxu0 %v3215_v21 }
0x14c1   :  { %v3086_v53 = vpop.f32.mrf.mxu0 }
0x14c2   :  { %v2341_v54 = vadd.f32 %v3086_v53, %v2262_v16 }
0x14c3   :  { %v2335_v55 = vpop.f32.mrf.mxu0 }
0x14c4   :  { %v2347_v56 = vmul.f32 0.044715, %v2341_v54  ;;  %v2336_v57 = vadd.f32 %v2335_v55, %v2262_v16  ;;  %v2345_v6 = vmul.f32 0.5, %v2341_v54 }
0x14c6   :  { %v2349_v58 = vmul.f32 %v2347_v56, %v2341_v54  ;;  %v2346_v59 = vmul.f32 0.044715, %v2336_v57  ;;  %v2344_v33 = vmul.f32 0.5, %v2336_v57 }
0x14c8   :  { %v2351_v61 = vmul.f32 %v2349_v58, %v2341_v54  ;;  %v2348_v14 = vmul.f32 %v2346_v59, %v2336_v57 }
0x14ca   :  { %v2353_v13 = vadd.f32 %v2351_v61, %v2341_v54  ;;  %v2350_v62 = vmul.f32 %v2348_v14, %v2336_v57 }
0x14cc   :  { %v2355_v63 = vmul.f32 0.7978846, %v2353_v13  ;;  %v2352_v0 = vadd.f32 %v2350_v62, %v2336_v57  ;;  %v2776_v57 = vld [vmem:[%s3789_s2 + $0xa8] ss:$0 sm:$0xff]  ;;  %v2778_v13 = vld [vmem:[%s3789_s2 + $0xd0] ss:$0 sm:$0xff] }
0x14cd   :  { %s3224_s2 = smov 8  }
0x14ce   :  { %3198 = vtanh.f32 %v2355_v63  ;;  %v2354_v1 = vmul.f32 0.7978846, %v2352_v0 }
0x14d0   :  { %3200 = vtanh.f32 %v2354_v1 }
0x14db   :  { %v3199_v2 = vpop.eup %3198 }
0x14dc   :  { %v2359_v4 = vadd.f32 1.0, %v3199_v2 }
0x14dd   :  { %v3201_v3 = vpop.eup %3200 }
0x14de   :  { %v2358_v5 = vadd.f32 1.0, %v3201_v3  ;;  %v2361_v9 = vmul.f32 %v2359_v4, %v2345_v6 }
0x14e0   :  { %v2360_v8 = vmul.f32 %v2358_v5, %v2344_v33 }
0x14e2   :  { %3103 = vmatprep.mubr.msk.f32.mxu1 %vm1251_vm8, %v2360_v8 }
0x14e3   :  { %3104 = vmatmul.mubr.msk.f32.vlgmr.msra.gmra.mxu1 %vm1251_vm8, %v2361_v9 }
0x15a3   :  { %v3105_v12 = vpop.f32.mrf.mxu1 }
0x15a4   :  { %v2444_v43 = vadd.f32 %v3105_v12, %v2365_v11 }
0x15a5   :  { %v2438_v18 = vpop.f32.mrf.mxu1 }
0x15a6   :  { %v2439_v19 = vadd.f32 %v2438_v18, %v2365_v11  ;;  %v2448_v22 = vadd.f32 %v2444_v43, %v2258_v44  ;;  %v3212_v43 = vld [vmem:[%s3792_s1] sm:$0x3] }
0x15a8   :  { %v2452_v47 = vsel %vm183_vm4, %v2448_v22, 0.0  ;;  %v2447_v46 = vadd.f32 %v2439_v19, %v3688_v42 }
0x15a9   :  { %2453 = vadd.xlane.f32.xlu0 %v2452_v47 }
0x15aa   :  { %v2449_v24 = vsel %vm183_vm4, %v2447_v46, 0.0 }
0x15ab   :  { %2450 = vadd.xlane.f32.xlu1 %v2449_v24 }
0x1632   :  { %v2454_v25 = vpop.xlane.xlu0 %2453 }
0x1633   :  { %v2456_v26 = vmul.f32 0.03125, %v2454_v25 }
0x1634   :  { %v2451_v27 = vpop.xlane.xlu1 %2450 }
0x1635   :  { %v2458_v28 = vsub.f32 %v2448_v22, %v2456_v26  ;;  %v2455_v29 = vmul.f32 0.03125, %v2451_v27 }
0x1637   :  { %v2457_v30 = vsub.f32 %v2447_v46, %v2455_v29  ;;  %v2460_v60 = vmul.f32 %v2458_v28, %v2458_v28 }
0x1639   :  { %v2464_v20 = vsel %vm183_vm4, %v2460_v60, 0.0  ;;  %v2459_v23 = vmul.f32 %v2457_v30, %v2457_v30 }
0x163a   :  { %2465 = vadd.xlane.f32.xlu0 %v2464_v20 }
0x163b   :  { %v2461_v31 = vsel %vm183_vm4, %v2459_v23, 0.0 }
0x163c   :  { %2462 = vadd.xlane.f32.xlu1 %v2461_v31 }
0x16c3   :  { %v2466_v40 = vpop.xlane.xlu0 %2465 }
0x16c4   :  { %v2468_v37 = vmul.f32 0.03125, %v2466_v40 }
0x16c5   :  { %v2463_v41 = vpop.xlane.xlu1 %2462 }
0x16c6   :  { %v2470_v42 = vadd.f32 1e-12, %v2468_v37  ;;  %v2467_v44 = vmul.f32 0.03125, %v2463_v41 }
0x16c8   :  { %3202 = vrsqrt.f32 %v2470_v42  ;;  %v2469_v7 = vadd.f32 1e-12, %v2467_v44 }
0x16ca   :  { %3204 = vrsqrt.f32 %v2469_v7 }
0x16d5   :  { %v3203_v45 = vpop.eup %3202 }
0x16d6   :  { %v2474_v17 = vmul.f32 %v3203_v45, %v2458_v28 }
0x16d7   :  { %v3205_v51 = vpop.eup %3204 }
0x16d8   :  { %v2473_v50 = vmul.f32 %v3205_v51, %v2457_v30  ;;  %v2480_v52 = vmul.f32 %v2478_v10, %v2474_v17 }
0x16da   :  { %v2479_v16 = vmul.f32 %v2478_v10, %v2473_v50  ;;  %v2486_v53 = vadd.f32 %v2484_v49, %v2480_v52 }
0x16dc   :  { %v2485_v54 = vadd.f32 %v2484_v49, %v2479_v16  ;;  %v2503_v55 = vrot.slane %v2486_v53, 7 }
0x16de   :  { %v2505_v56 = vsel %vm2504_vm9, %v2503_v55, %v2485_v54 }
0x16df   :  { %3115 = vmatmul.mubr.msk.f32.vlgmr.msra.gmra.mxu0 %vm183_vm4, %v2505_v56 }
0x16e0   :  { %3125 = vmatprep.mubr.msk.f32.mxu0 %vm3216_vm5, %v3215_v21  ;;  %3118 = vmatpush3.msra.mxu0 %v2495_v15 }
0x16e1   :  { %3119 = vmatprep.subr.mxu0 %v3215_v21 }
0x16e2   :  { %3120 = vmatpush3.msra.mxu0 %v2494_v32 }
0x16e3   :  { %3121 = vmatprep.subr.mxu0 %v3215_v21 }
0x16e4   :  { %3122 = vmatpush3.msra.mxu0 %v2493_v36 }
0x16e5   :  { %3123 = vmatprep.subr.mxu0 %v3215_v21 }
0x16e6   :  { %3124 = vmatpush3.msra.mxu0 %v2492_v48 }
0x179f   :  { %v2574_v58 = vpop.f32.mrf.mxu0 }
0x17a0   :  { %v2575_v59 = vadd.f32 %v2776_v57, %v2574_v58 }
0x17a1   :  { %v3116_v61 = vpop.f32.mrf.mxu0 }
0x17a2   :  { %3206 = vtanh.f32 %v2575_v59 }
0x17af   :  { %v3207_v14 = vpop.eup %3206 }
0x17b0   :  { %3126 = vmatmul.mubr.msk.f32.vlgmr.msra.gmra.mxu0 %vm183_vm4, %v3207_v14 }
0x1870   :  { %v2652_v62 = vpop.f32.mrf.mxu0 }
0x1871   :  { %v2653_v63 = vadd.f32 %v2778_v13, %v2652_v62 }
0x1872   :  { %v3127_v21 = vpop.f32.mrf.mxu0 }
0x1873   :  { %v2657_v0 = vsel %vm2656_vm10, %v2653_v63, -inf }
0x1874   :  { %2658 = vmax.xlane.f32.xlu0 %v2657_v0 }
0x18fd   :  { %v2659_v1 = vpop.xlane.xlu0 %2658 }
0x18fe   :  { %v2660_v2 = vsub.f32 %v2653_v63, %v2659_v1 }
0x1900   :  { %v2661_v3 = vmul.f32 1.442695, %v2660_v2 }
0x1902   :  { %3208 = vpow2.f32 %v2661_v3 }
0x190f   :  { %v3209_v4 = vpop.eup %3208 }
0x1910   :  { %v2663_v33 = vsel %vm2656_vm10, %v3209_v4, 0.0 }
0x1911   :  { %2664 = vadd.xlane.f32.xlu1 %v2663_v33 }
0x199a   :  { %v2665_v5 = vpop.xlane.xlu1 %2664 }
0x199b   :  { %3210 = vlog2.f32 %v2665_v5 }
0x19a8   :  { %v3211_v6 = vpop.eup %3210 }
0x19a9   :  { %v2667_v8 = vmul.f32 0.6931472, %v3211_v6 }
0x19ab   :  { %v2668_v9 = vadd.f32 %v2667_v8, %v2659_v1 }
0x19ad   :  { %v2669_v11 = vsub.f32 %v2653_v63, %v2668_v9 }
0x19af   :  { %2671 = vrot.lane.b32.xlu0 %v2669_v11, %s3224_s2 }
0x1a21   :  { %v2672_v12 = vpop.permute.xlu0 %2671 }
0x1a22   :  { %v2674_v18 = vmul.f32 %v3212_v43, %v2672_v12 }
0x1a24   :  { %2676 = vrot.lane.b32.xlu1 %v2674_v18, %s3225_s7 }
0x1a96   :  { %v2677_v19 = vpop.permute.xlu1 %2676 }
0x1a97   :  { %v2679_v22 = vsel %vm2656_vm10, %v2677_v19, 0.0 }
0x1a98   :  { %2680 = vadd.xlane.f32.xlu1 %v2679_v22 }
0x1b21   :  { %v2681_v47 = vpop.xlane.xlu1 %2680 }
0x1b22   :  { %v2682_v46 = vsub.f32 0.0, %v2681_v47 }
0x1b24   :  { %v2684_v24 = vsel %vm2683_vm11, %v2682_v46, 0.0 }
0x1b25   :  { %2685 = vadd.xlane.f32.xlu0 %v2684_v24 }
0x1bae   :  { %v2686_v25 = vpop.xlane.xlu0 %2685 }
0x1baf   :  { %v2687_v26 = vrot.slane %v2686_v25, 4 }
0x1bb1   :  { %v2688_v27 = vadd.f32 %v2687_v26, %v2686_v25 }
0x1bb3   :  { %v2689_v28 = vrot.slane %v2688_v27, 2 }
0x1bb5   :  { %v2690_v29 = vadd.f32 %v2689_v28, %v2688_v27 }
0x1bb7   :  { %v2691_v30 = vrot.slane %v2690_v29, 1 }
0x1bb9   :  { %v2692_v60 = vadd.f32 %v2691_v30, %v2690_v29 }
0x1bbb   :  { %3128 = vpush %v2692_v60 }
0x1bec   :  { %s3129_s1 = spop %3128 }
0x1bed   :  { %v2694_v20 = vstv %s3129_s1 }
0x1bee   :  { %v2695_v23 = vmul.f32 0.5, %v2694_v20 }
0x1bf0   :  { %v2697_v31 = vsel %vm2696_vm12, %v2653_v63, %v2695_v23 }
0x1bf1   :  { %v2699_v34 = vsel %vm2698_vm13, %v2697_v31, 0.0 }
0x1bf2   :  { %2700 = vst [vmem:[%s3794_s6] sm:$0x3] %v2699_v34 }

</bundles_post_ra>
